<compile_context>
chip_gen: v7x
topology: tpu7x:2x2x1
jax: 0.10.0
libtpu: 0.0.40
codegen_flags: <defaults>
</compile_context>

<pallas_src>
import functools

import jax
import jax.numpy as jnp
from jax import lax
from jax.experimental import pallas as pl
from jax.experimental.pallas import tpu as pltpu


_F_SMALL = 64      # x11 / x22 feature width
_F_BIG = 512       # xf51 / xf52 feature width
_NOUT = 640        # 64 + 512 packed, padded to a multiple of 128
_HEAD_W = 128      # padded block-diagonal head matmul width
_SLAB = 512        # packed output slab width (multiple of 128)
_TK = 512          # K (din) tile size

# Packed-output slab layout (f32 columns):
#   [  0: 32)  content2   \  v1 = cat(content2, style1)
#   [ 32: 64)  style1     /
#   [ 64: 96)  content1   \  v2 = cat(content1, style2)
#   [ 96:128)  style2     /
#   [128:192)  x11
#   [192:256)  x22
#   [256:258)  out1 = leaky_relu(linear1(content))
#   [258:260)  out2 = leaky_relu(linear2(style1))
#   [260:262)  out3 = leaky_relu(linear3(style2))
#   [384:387)  vc1  = contrastive logits
#   everything else is zero padding.


# ----------------------------------------------------------------------------
# Fused kernel: two K-tiled backbone matmuls + full DCNN head
# ----------------------------------------------------------------------------
def _dcnn_fused_kernel(
    x1_ref, x2_ref, w1_ref, w2_ref, b1_ref, b2_ref, wh_ref, bh_ref,
    out_ref, acc1_ref, acc2_ref,
):
    k = pl.program_id(0)
    nk = pl.num_programs(0)

    @pl.when(k == 0)
    def _init():
        acc1_ref[...] = jnp.zeros_like(acc1_ref)
        acc2_ref[...] = jnp.zeros_like(acc2_ref)

    # One lane-dense (B, 640) MXU stream per backbone per K-tile (bf16 inputs,
    # fp32 accumulation).
    acc1_ref[...] += jnp.dot(x1_ref[...], w1_ref[...],
                             preferred_element_type=jnp.float32)
    acc2_ref[...] += jnp.dot(x2_ref[...], w2_ref[...],
                             preferred_element_type=jnp.float32)

    @pl.when(k == nk - 1)
    def _head():
        f1 = acc1_ref[...] + b1_ref[...]          # (B, 640) fp32
        f2 = acc2_ref[...] + b2_ref[...]

        x11 = f1[:, :_F_SMALL]
        xf51 = f1[:, _F_SMALL:_F_SMALL + _F_BIG]
        x22 = f2[:, :_F_SMALL]
        xf52 = f2[:, _F_SMALL:_F_SMALL + _F_BIG]

        # split([32, 32], dim=1)
        style1, content1 = x11[:, :32], x11[:, 32:64]
        style2, content2 = x22[:, :32], x22[:, 32:64]

        # split([256, 256], dim=1)
        s51, c51 = xf51[:, :256], xf51[:, 256:512]
        s52, c52 = xf52[:, :256], xf52[:, 256:512]

        def l2norm(v):
            # torch.nn.functional.normalize: v / max(||v||, 1e-12)
            #   == v * rsqrt(max(||v||^2, 1e-24))  (single EUP op)
            ss = jnp.sum(v * v, axis=1, keepdims=True)
            return v * lax.rsqrt(jnp.maximum(ss, 1e-24))

        c51n = l2norm(c51)
        s51n = l2norm(s51)
        c52n = l2norm(c52)
        s52n = l2norm(s52)

        inv_t = 1.0 / 0.3
        plogit = jnp.sum(c51n * c52n, axis=-1, keepdims=True) * inv_t
        nlogit1 = jnp.sum(c51n * s51n, axis=-1, keepdims=True) * inv_t
        nlogit2 = jnp.sum(c52n * s52n, axis=-1, keepdims=True) * inv_t

        # One block-diagonal matmul replaces linear1/linear2/linear3.
        z = jnp.concatenate([x11, x22], axis=-1)                    # (B, 128)
        h = jnp.dot(z, wh_ref[...], preferred_element_type=jnp.float32) \
            + bh_ref[...]
        h = jnp.where(h >= 0, h, 0.01 * h)      # F.leaky_relu (slope 0.01)

        # Pack every module output into one lane-dense (B, 512) slab and write
        # it with a single full, unmasked store.
        b = z.shape[0]
        vc1_pad = jnp.concatenate(
            [plogit, nlogit1, nlogit2,
             jnp.zeros((b, _SLAB - 384 - 3), jnp.float32)], axis=-1)  # (B,128)
        out_ref[...] = jnp.concatenate(
            [content2, style1, content1, style2, x11, x22, h, vc1_pad],
            axis=-1)                                                  # (B,512)


# ----------------------------------------------------------------------------
# Parameter packing helpers (wrapper side)
# ----------------------------------------------------------------------------
def _pack_backbone(wf, bf, w5, b5, din, din_pad):
    # [Wf | W5 | 0] -> (din_pad, 640) bf16, [bf | b5 | 0] -> (1, 640) fp32
    pad_cols = _NOUT - _F_SMALL - _F_BIG
    w = jnp.concatenate([wf, w5, jnp.zeros((din, pad_cols), jnp.float32)], axis=1)
    if din_pad > din:
        w = jnp.pad(w, ((0, din_pad - din), (0, 0)))
    b = jnp.concatenate([bf, b5, jnp.zeros((1, pad_cols), jnp.float32)], axis=1)
    return w.astype(jnp.bfloat16), b


def _pack_head(w1, b1, w2, b2, w3, b3):
    # z = [x11 | x22] = [style1 | content1 | style2 | content2]; route slices
    # to [out1 | out2 | out3] via one (128,128) block-diagonal weight.
    wh = jnp.zeros((_HEAD_W, _HEAD_W), jnp.float32)
    wh = wh.at[0:32, 2:4].set(w2)            # style1   -> out2
    wh = wh.at[32:64, 0:2].set(w1[0:32])     # content1 -> out1 (rows 0..31 of w1)
    wh = wh.at[64:96, 4:6].set(w3)           # style2   -> out3
    wh = wh.at[96:128, 0:2].set(w1[32:64])   # content2 -> out1 (rows 32..63 of w1)
    bh = jnp.zeros((1, _HEAD_W), jnp.float32)
    bh = bh.at[:, 0:2].set(b1).at[:, 2:4].set(b2).at[:, 4:6].set(b3)
    return wh, bh


# ----------------------------------------------------------------------------
# Full DCNN forward (single pallas_call)
# ----------------------------------------------------------------------------
def dcnn_forward(params, x1, x2):
    p = params
    bsz = x1.shape[0]
    x1f = x1.reshape(bsz, -1).astype(jnp.float32)
    x2f = x2.reshape(bsz, -1).astype(jnp.float32)
    din = x1f.shape[1]

    din_pad = ((din + _TK - 1) // _TK) * _TK
    nk = din_pad // _TK
    if din_pad > din:
        pad = ((0, 0), (0, din_pad - din))
        x1f = jnp.pad(x1f, pad)
        x2f = jnp.pad(x2f, pad)
    x1b = x1f.astype(jnp.bfloat16)
    x2b = x2f.astype(jnp.bfloat16)

    w1c, b1c = _pack_backbone(p["r1_wf"], p["r1_bf"], p["r1_w5"], p["r1_b5"],
                              din, din_pad)
    w2c, b2c = _pack_backbone(p["r2_wf"], p["r2_bf"], p["r2_w5"], p["r2_b5"],
                              din, din_pad)
    wh, bh = _pack_head(p["w1"], p["b1"], p["w2"], p["b2"], p["w3"], p["b3"])

    slab = pl.pallas_call(
        _dcnn_fused_kernel,
        out_shape=jax.ShapeDtypeStruct((bsz, _SLAB), jnp.float32),
        grid=(nk,),
        in_specs=[
            pl.BlockSpec((bsz, _TK), lambda k: (0, k)),       # x1 tile
            pl.BlockSpec((bsz, _TK), lambda k: (0, k)),       # x2 tile
            pl.BlockSpec((_TK, _NOUT), lambda k: (k, 0)),     # packed W (backbone 1)
            pl.BlockSpec((_TK, _NOUT), lambda k: (k, 0)),     # packed W (backbone 2)
            pl.BlockSpec((1, _NOUT), lambda k: (0, 0)),       # packed bias 1
            pl.BlockSpec((1, _NOUT), lambda k: (0, 0)),       # packed bias 2
            pl.BlockSpec((_HEAD_W, _HEAD_W), lambda k: (0, 0)),  # head weight
            pl.BlockSpec((1, _HEAD_W), lambda k: (0, 0)),        # head bias
        ],
        out_specs=pl.BlockSpec((bsz, _SLAB), lambda k: (0, 0)),
        scratch_shapes=[
            pltpu.VMEM((bsz, _NOUT), jnp.float32),   # backbone-1 accumulator
            pltpu.VMEM((bsz, _NOUT), jnp.float32),   # backbone-2 accumulator
        ],
        compiler_params=pltpu.CompilerParams(
            dimension_semantics=("arbitrary",),
        ),
    )(x1b, x2b, w1c, w2c, b1c, b2c, wh, bh)

    out1 = slab[:, 256:258]
    out2 = slab[:, 258:260]
    out3 = slab[:, 260:262]
    v1 = slab[:, 0:64]
    v2 = slab[:, 64:128]
    x11 = slab[:, 128:192]
    x22 = slab[:, 192:256]
    vc1 = slab[:, 384:387]
    # Same 8-tuple as the PyTorch forward.
    return out1, out2, out3, v1, v2, x11, x22, vc1


# ----------------------------------------------------------------------------
# Pure-JAX reference (mirrors the kernel's bf16-input / fp32-accumulate math)
# ----------------------------------------------------------------------------
def _reference_forward(params, x1, x2):
    p = params
    bsz = x1.shape[0]
    x1f = x1.reshape(bsz, -1).astype(jnp.bfloat16)
    x2f = x2.reshape(bsz, -1).astype(jnp.bfloat16)

    def backbone(xf, wf, bf, w5, b5):
        a = jnp.dot(xf, wf.astype(jnp.bfloat16),
                    preferred_element_type=jnp.float32) + bf
        b = jnp.dot(xf, w5.astype(jnp.bfloat16),
                    preferred_element_type=jnp.float32) + b5
        return a, b

    x11, xf51 = backbone(x1f, p["r1_wf"], p["r1_bf"], p["r1_w5"], p["r1_b5"])
    x22, xf52 = backbone(x2f, p["r2_wf"], p["r2_bf"], p["r2_w5"], p["r2_b5"])

    style1, content1 = x11[:, :32], x11[:, 32:]
    style2, content2 = x22[:, :32], x22[:, 32:]
    content = jnp.concatenate([content1, content2], axis=-1)
    s51, c51 = xf51[:, :256], xf51[:, 256:]
    s52, c52 = xf52[:, :256], xf52[:, 256:]

    def norm(v):
        n = jnp.sqrt(jnp.sum(v * v, axis=1, keepdims=True))
        return v / jnp.maximum(n, 1e-12)

    c51n, s51n, c52n, s52n = norm(c51), norm(s51), norm(c52), norm(s52)
    plogit = jnp.sum(c51n * c52n, -1, keepdims=True) / 0.3
    nlogit1 = jnp.sum(c51n * s51n, -1, keepdims=True) / 0.3
    nlogit2 = jnp.sum(c52n * s52n, -1, keepdims=True) / 0.3
    vc1 = jnp.concatenate([plogit, nlogit1, nlogit2], axis=1)

    def lrelu(z):
        return jnp.where(z >= 0, z, 0.01 * z)

    out1 = lrelu(content @ p["w1"] + p["b1"])
    out2 = lrelu(style1 @ p["w2"] + p["b2"])
    out3 = lrelu(style2 @ p["w3"] + p["b3"])
    v1 = jnp.concatenate([content2, style1], axis=-1)
    v2 = jnp.concatenate([content1, style2], axis=-1)
    return out1, out2, out3, v1, v2, x11, x22, vc1


# ----------------------------------------------------------------------------
# Parameter init (PyTorch nn.Linear-style uniform init)
# ----------------------------------------------------------------------------
def init_params(key, din):
    keys = jax.random.split(key, 14)

    def lin(kw, kb, fan_in, fan_out):
        bound = 1.0 / jnp.sqrt(fan_in)
        w = jax.random.uniform(kw, (fan_in, fan_out), jnp.float32, -bound, bound)
        b = jax.random.uniform(kb, (1, fan_out), jnp.float32, -bound, bound)
        return w, b

    r1_wf, r1_bf = lin(keys[0], keys[1], din, 64)
    r1_w5, r1_b5 = lin(keys[2], keys[3], din, 512)
    r2_wf, r2_bf = lin(keys[4], keys[5], din, 64)
    r2_w5, r2_b5 = lin(keys[6], keys[7], din, 512)
    w1, b1 = lin(keys[8], keys[9], 64, 2)    # nn.Linear(64, 2)
    w2, b2 = lin(keys[10], keys[11], 32, 2)  # nn.Linear(32, 2)
    w3, b3 = lin(keys[12], keys[13], 32, 2)  # nn.Linear(32, 2)
    return dict(
        r1_wf=r1_wf, r1_bf=r1_bf, r1_w5=r1_w5, r1_b5=r1_b5,
        r2_wf=r2_wf, r2_bf=r2_bf, r2_w5=r2_w5, r2_b5=r2_b5,
        w1=w1, b1=b1, w2=w2, b2=b2, w3=w3, b3=b3,
    )


if __name__ == "__main__":
    key = jax.random.PRNGKey(0)
    kx1, kx2, kp = jax.random.split(key, 3)

    B, C, H, W = 2, 4, 16, 16
    x1 = jax.random.normal(kx1, (B, C, H, W), jnp.float32)
    x2 = jax.random.normal(kx2, (B, C, H, W), jnp.float32)

    params = init_params(kp, C * H * W)

    fwd = jax.jit(functools.partial(dcnn_forward, params))
    outs = fwd(x1, x2)
    jax.block_until_ready(outs)

    # shape checks (same 8-tuple as the PyTorch forward)
    expected = [(B, 2), (B, 2), (B, 2), (B, 64), (B, 64), (B, 64), (B, 64), (B, 3)]
    for o, s in zip(outs, expected):
        assert o.shape == s, (o.shape, s)

    # numerical check against a pure-JAX reference of the same math
    ref = jax.jit(functools.partial(_reference_forward, params))(x1, x2)
    jax.block_until_ready(ref)
    for i, (got, want) in enumerate(zip(outs, ref)):
        err = float(jnp.max(jnp.abs(got.astype(jnp.float32) -
                                    want.astype(jnp.float32))))
        assert err < 2e-2, f"output {i} mismatch, max abs err {err}"

    print("KERNEL_OK")
</pallas_src>

<mosaic_0001>
module attributes {stable_mosaic.version = 11 : i64} {
  func.func @_dcnn_fused_kernel(%arg0: i32, %arg1: memref<2x512xbf16, #tpu.memory_space<vmem>>, %arg2: memref<2x512xbf16, #tpu.memory_space<vmem>>, %arg3: memref<512x640xbf16, #tpu.memory_space<vmem>>, %arg4: memref<512x640xbf16, #tpu.memory_space<vmem>>, %arg5: memref<1x640xf32, #tpu.memory_space<vmem>>, %arg6: memref<1x640xf32, #tpu.memory_space<vmem>>, %arg7: memref<128x128xf32, #tpu.memory_space<vmem>>, %arg8: memref<1x128xf32, #tpu.memory_space<vmem>>, %arg9: memref<2x512xf32, #tpu.memory_space<vmem>>, %arg10: memref<2x640xf32, #tpu.memory_space<vmem>>, %arg11: memref<2x640xf32, #tpu.memory_space<vmem>>) attributes {dimension_semantics = [#tpu.dimension_semantics<arbitrary>], iteration_bounds = array<i64: 2>, scalar_prefetch = 0 : i64, scratch_operands = 2 : i64, tpu.core_type = #tpu.core_type<tc>, window_params = [{transform_indices = @transform_0, window_bounds = array<i64: 2, 512>}, {transform_indices = @transform_1, window_bounds = array<i64: 2, 512>}, {transform_indices = @transform_2, window_bounds = array<i64: 512, 640>}, {transform_indices = @transform_3, window_bounds = array<i64: 512, 640>}, {pipeline_mode = #tpu.pipeline_mode<synchronous>, transform_indices = @transform_4, window_bounds = array<i64: 1, 640>}, {pipeline_mode = #tpu.pipeline_mode<synchronous>, transform_indices = @transform_5, window_bounds = array<i64: 1, 640>}, {pipeline_mode = #tpu.pipeline_mode<synchronous>, transform_indices = @transform_6, window_bounds = array<i64: 128, 128>}, {pipeline_mode = #tpu.pipeline_mode<synchronous>, transform_indices = @transform_7, window_bounds = array<i64: 1, 128>}, {pipeline_mode = #tpu.pipeline_mode<synchronous>, transform_indices = @transform_8, window_bounds = array<i64: 2, 512>}]} {
    %c0_i32 = arith.constant 0 : i32
    %0 = arith.cmpi eq, %arg0, %c0_i32 : i32
    %1 = arith.extui %0 : i1 to i32
    %c0_i32_0 = arith.constant 0 : i32
    %2 = arith.cmpi ne, %1, %c0_i32_0 : i32
    scf.if %2 {
      %cst_18 = arith.constant 0.000000e+00 : f32
      %18 = vector.broadcast %cst_18 : f32 to vector<2x640xf32>
      %c0_19 = arith.constant 0 : index
      %c0_20 = arith.constant 0 : index
      %19 = vector.load %arg10[%c0_19, %c0_20] : memref<2x640xf32, #tpu.memory_space<vmem>>, vector<2x640xf32>
      tpu.vector_store %arg10[%c0_19, %c0_20], %18 {strides = array<i32>} : memref<2x640xf32, #tpu.memory_space<vmem>>, vector<2x640xf32>,
      %cst_21 = arith.constant 0.000000e+00 : f32
      %20 = vector.broadcast %cst_21 : f32 to vector<2x640xf32>
      %c0_22 = arith.constant 0 : index
      %c0_23 = arith.constant 0 : index
      %21 = vector.load %arg11[%c0_22, %c0_23] : memref<2x640xf32, #tpu.memory_space<vmem>>, vector<2x640xf32>
      tpu.vector_store %arg11[%c0_22, %c0_23], %20 {strides = array<i32>} : memref<2x640xf32, #tpu.memory_space<vmem>>, vector<2x640xf32>,
    } else {
    }
    %c0 = arith.constant 0 : index
    %c0_1 = arith.constant 0 : index
    %3 = vector.load %arg10[%c0, %c0_1] : memref<2x640xf32, #tpu.memory_space<vmem>>, vector<2x640xf32>
    %c0_2 = arith.constant 0 : index
    %c0_3 = arith.constant 0 : index
    %4 = vector.load %arg1[%c0_2, %c0_3] : memref<2x512xbf16, #tpu.memory_space<vmem>>, vector<2x512xbf16>
    %c0_4 = arith.constant 0 : index
    %c0_5 = arith.constant 0 : index
    %5 = vector.load %arg3[%c0_4, %c0_5] : memref<512x640xbf16, #tpu.memory_space<vmem>>, vector<512x640xbf16>
    %cst = arith.constant dense<0.000000e+00> : vector<2x640xf32>
    %6 = tpu.matmul %4, %5, %cst {dimension_numbers = #tpu.dot_dimension_numbers<[1], [0], [0], [1], [0, 0, 1, 1], [], []>} : vector<2x512xbf16>, vector<512x640xbf16>, vector<2x640xf32> -> vector<2x640xf32>
    %7 = arith.addf %3, %6 : vector<2x640xf32>
    %c0_6 = arith.constant 0 : index
    %c0_7 = arith.constant 0 : index
    %8 = vector.load %arg10[%c0_6, %c0_7] : memref<2x640xf32, #tpu.memory_space<vmem>>, vector<2x640xf32>
    tpu.vector_store %arg10[%c0_6, %c0_7], %7 {strides = array<i32>} : memref<2x640xf32, #tpu.memory_space<vmem>>, vector<2x640xf32>,
    %c0_8 = arith.constant 0 : index
    %c0_9 = arith.constant 0 : index
    %9 = vector.load %arg11[%c0_8, %c0_9] : memref<2x640xf32, #tpu.memory_space<vmem>>, vector<2x640xf32>
    %c0_10 = arith.constant 0 : index
    %c0_11 = arith.constant 0 : index
    %10 = vector.load %arg2[%c0_10, %c0_11] : memref<2x512xbf16, #tpu.memory_space<vmem>>, vector<2x512xbf16>
    %c0_12 = arith.constant 0 : index
    %c0_13 = arith.constant 0 : index
    %11 = vector.load %arg4[%c0_12, %c0_13] : memref<512x640xbf16, #tpu.memory_space<vmem>>, vector<512x640xbf16>
    %cst_14 = arith.constant dense<0.000000e+00> : vector<2x640xf32>
    %12 = tpu.matmul %10, %11, %cst_14 {dimension_numbers = #tpu.dot_dimension_numbers<[1], [0], [0], [1], [0, 0, 1, 1], [], []>} : vector<2x512xbf16>, vector<512x640xbf16>, vector<2x640xf32> -> vector<2x640xf32>
    %13 = arith.addf %9, %12 : vector<2x640xf32>
    %c0_15 = arith.constant 0 : index
    %c0_16 = arith.constant 0 : index
    %14 = vector.load %arg11[%c0_15, %c0_16] : memref<2x640xf32, #tpu.memory_space<vmem>>, vector<2x640xf32>
    tpu.vector_store %arg11[%c0_15, %c0_16], %13 {strides = array<i32>} : memref<2x640xf32, #tpu.memory_space<vmem>>, vector<2x640xf32>,
    %c1_i32 = arith.constant 1 : i32
    %15 = arith.cmpi eq, %arg0, %c1_i32 : i32
    %16 = arith.extui %15 : i1 to i32
    %c0_i32_17 = arith.constant 0 : i32
    %17 = arith.cmpi ne, %16, %c0_i32_17 : i32
    scf.if %17 {
      %c0_18 = arith.constant 0 : index
      %c0_19 = arith.constant 0 : index
      %18 = vector.load %arg10[%c0_18, %c0_19] : memref<2x640xf32, #tpu.memory_space<vmem>>, vector<2x640xf32>
      %c0_20 = arith.constant 0 : index
      %c0_21 = arith.constant 0 : index
      %19 = vector.load %arg5[%c0_20, %c0_21] : memref<1x640xf32, #tpu.memory_space<vmem>>, vector<1x640xf32>
      %20 = vector.broadcast %19 : vector<1x640xf32> to vector<2x640xf32>
      %21 = arith.addf %18, %20 : vector<2x640xf32>
      %c0_22 = arith.constant 0 : index
      %c0_23 = arith.constant 0 : index
      %22 = vector.load %arg11[%c0_22, %c0_23] : memref<2x640xf32, #tpu.memory_space<vmem>>, vector<2x640xf32>
      %c0_24 = arith.constant 0 : index
      %c0_25 = arith.constant 0 : index
      %23 = vector.load %arg6[%c0_24, %c0_25] : memref<1x640xf32, #tpu.memory_space<vmem>>, vector<1x640xf32>
      %24 = vector.broadcast %23 : vector<1x640xf32> to vector<2x640xf32>
      %25 = arith.addf %22, %24 : vector<2x640xf32>
      %26 = vector.extract_strided_slice %21 {offsets = [0, 0], sizes = [2, 64], strides = [1, 1]} : vector<2x640xf32> to vector<2x64xf32>
      %27 = vector.extract_strided_slice %21 {offsets = [0, 64], sizes = [2, 512], strides = [1, 1]} : vector<2x640xf32> to vector<2x512xf32>
      %28 = vector.extract_strided_slice %25 {offsets = [0, 0], sizes = [2, 64], strides = [1, 1]} : vector<2x640xf32> to vector<2x64xf32>
      %29 = vector.extract_strided_slice %25 {offsets = [0, 64], sizes = [2, 512], strides = [1, 1]} : vector<2x640xf32> to vector<2x512xf32>
      %30 = vector.extract_strided_slice %26 {offsets = [0, 0], sizes = [2, 32], strides = [1, 1]} : vector<2x64xf32> to vector<2x32xf32>
      %31 = vector.extract_strided_slice %26 {offsets = [0, 32], sizes = [2, 32], strides = [1, 1]} : vector<2x64xf32> to vector<2x32xf32>
      %32 = vector.extract_strided_slice %28 {offsets = [0, 0], sizes = [2, 32], strides = [1, 1]} : vector<2x64xf32> to vector<2x32xf32>
      %33 = vector.extract_strided_slice %28 {offsets = [0, 32], sizes = [2, 32], strides = [1, 1]} : vector<2x64xf32> to vector<2x32xf32>
      %34 = vector.extract_strided_slice %27 {offsets = [0, 0], sizes = [2, 256], strides = [1, 1]} : vector<2x512xf32> to vector<2x256xf32>
      %35 = vector.extract_strided_slice %27 {offsets = [0, 256], sizes = [2, 256], strides = [1, 1]} : vector<2x512xf32> to vector<2x256xf32>
      %36 = vector.extract_strided_slice %29 {offsets = [0, 0], sizes = [2, 256], strides = [1, 1]} : vector<2x512xf32> to vector<2x256xf32>
      %37 = vector.extract_strided_slice %29 {offsets = [0, 256], sizes = [2, 256], strides = [1, 1]} : vector<2x512xf32> to vector<2x256xf32>
      %38 = arith.mulf %35, %35 : vector<2x256xf32>
      %cst_26 = arith.constant dense<0.000000e+00> : vector<2xf32>
      %39 = vector.multi_reduction <add>, %38, %cst_26 [1] : vector<2x256xf32> to vector<2xf32>
      %40 = vector.shape_cast %39 : vector<2xf32> to vector<2x1xf32>
      %cst_27 = arith.constant 1.000000e-24 : f32
      %41 = vector.broadcast %cst_27 : f32 to vector<2x1xf32>
      %42 = arith.maximumf %40, %41 : vector<2x1xf32>
      %43 = math.rsqrt %42 : vector<2x1xf32>
      %44 = vector.broadcast %43 : vector<2x1xf32> to vector<2x256xf32>
      %45 = arith.mulf %35, %44 : vector<2x256xf32>
      %46 = arith.mulf %34, %34 : vector<2x256xf32>
      %cst_28 = arith.constant dense<0.000000e+00> : vector<2xf32>
      %47 = vector.multi_reduction <add>, %46, %cst_28 [1] : vector<2x256xf32> to vector<2xf32>
      %48 = vector.shape_cast %47 : vector<2xf32> to vector<2x1xf32>
      %cst_29 = arith.constant 1.000000e-24 : f32
      %49 = vector.broadcast %cst_29 : f32 to vector<2x1xf32>
      %50 = arith.maximumf %48, %49 : vector<2x1xf32>
      %51 = math.rsqrt %50 : vector<2x1xf32>
      %52 = vector.broadcast %51 : vector<2x1xf32> to vector<2x256xf32>
      %53 = arith.mulf %34, %52 : vector<2x256xf32>
      %54 = arith.mulf %37, %37 : vector<2x256xf32>
      %cst_30 = arith.constant dense<0.000000e+00> : vector<2xf32>
      %55 = vector.multi_reduction <add>, %54, %cst_30 [1] : vector<2x256xf32> to vector<2xf32>
      %56 = vector.shape_cast %55 : vector<2xf32> to vector<2x1xf32>
      %cst_31 = arith.constant 1.000000e-24 : f32
      %57 = vector.broadcast %cst_31 : f32 to vector<2x1xf32>
      %58 = arith.maximumf %56, %57 : vector<2x1xf32>
      %59 = math.rsqrt %58 : vector<2x1xf32>
      %60 = vector.broadcast %59 : vector<2x1xf32> to vector<2x256xf32>
      %61 = arith.mulf %37, %60 : vector<2x256xf32>
      %62 = arith.mulf %36, %36 : vector<2x256xf32>
      %cst_32 = arith.constant dense<0.000000e+00> : vector<2xf32>
      %63 = vector.multi_reduction <add>, %62, %cst_32 [1] : vector<2x256xf32> to vector<2xf32>
      %64 = vector.shape_cast %63 : vector<2xf32> to vector<2x1xf32>
      %cst_33 = arith.constant 1.000000e-24 : f32
      %65 = vector.broadcast %cst_33 : f32 to vector<2x1xf32>
      %66 = arith.maximumf %64, %65 : vector<2x1xf32>
      %67 = math.rsqrt %66 : vector<2x1xf32>
      %68 = vector.broadcast %67 : vector<2x1xf32> to vector<2x256xf32>
      %69 = arith.mulf %36, %68 : vector<2x256xf32>
      %70 = arith.mulf %45, %61 : vector<2x256xf32>
      %cst_34 = arith.constant dense<0.000000e+00> : vector<2xf32>
      %71 = vector.multi_reduction <add>, %70, %cst_34 [1] : vector<2x256xf32> to vector<2xf32>
      %72 = vector.shape_cast %71 : vector<2xf32> to vector<2x1xf32>
      %cst_35 = arith.constant 3.33333325 : f32
      %73 = vector.broadcast %cst_35 : f32 to vector<2x1xf32>
      %74 = arith.mulf %72, %73 : vector<2x1xf32>
      %75 = arith.mulf %45, %53 : vector<2x256xf32>
      %cst_36 = arith.constant dense<0.000000e+00> : vector<2xf32>
      %76 = vector.multi_reduction <add>, %75, %cst_36 [1] : vector<2x256xf32> to vector<2xf32>
      %77 = vector.shape_cast %76 : vector<2xf32> to vector<2x1xf32>
      %cst_37 = arith.constant 3.33333325 : f32
      %78 = vector.broadcast %cst_37 : f32 to vector<2x1xf32>
      %79 = arith.mulf %77, %78 : vector<2x1xf32>
      %80 = arith.mulf %61, %69 : vector<2x256xf32>
      %cst_38 = arith.constant dense<0.000000e+00> : vector<2xf32>
      %81 = vector.multi_reduction <add>, %80, %cst_38 [1] : vector<2x256xf32> to vector<2xf32>
      %82 = vector.shape_cast %81 : vector<2xf32> to vector<2x1xf32>
      %cst_39 = arith.constant 3.33333325 : f32
      %83 = vector.broadcast %cst_39 : f32 to vector<2x1xf32>
      %84 = arith.mulf %82, %83 : vector<2x1xf32>
      %85 = tpu.concatenate %26, %28 in 1 : vector<2x64xf32>, vector<2x64xf32> -> vector<2x128xf32>
      %c0_40 = arith.constant 0 : index
      %c0_41 = arith.constant 0 : index
      %86 = vector.load %arg7[%c0_40, %c0_41] : memref<128x128xf32, #tpu.memory_space<vmem>>, vector<128x128xf32>
      %cst_42 = arith.constant dense<0.000000e+00> : vector<2x128xf32>
      %87 = tpu.matmul %85, %86, %cst_42 {dimension_numbers = #tpu.dot_dimension_numbers<[1], [0], [0], [1], [0, 0, 1, 1], [], []>} : vector<2x128xf32>, vector<128x128xf32>, vector<2x128xf32> -> vector<2x128xf32>
      %c0_43 = arith.constant 0 : index
      %c0_44 = arith.constant 0 : index
      %88 = vector.load %arg8[%c0_43, %c0_44] : memref<1x128xf32, #tpu.memory_space<vmem>>, vector<1x128xf32>
      %89 = vector.broadcast %88 : vector<1x128xf32> to vector<2x128xf32>
      %90 = arith.addf %87, %89 : vector<2x128xf32>
      %cst_45 = arith.constant 0.000000e+00 : f32
      %91 = vector.broadcast %cst_45 : f32 to vector<2x128xf32>
      %92 = arith.cmpf oge, %90, %91 : vector<2x128xf32>
      %cst_46 = arith.constant 0.00999999977 : f32
      %93 = vector.broadcast %cst_46 : f32 to vector<2x128xf32>
      %94 = arith.mulf %93, %90 : vector<2x128xf32>
      %95 = arith.select %92, %90, %94 : vector<2x128xi1>, vector<2x128xf32>
      %cst_47 = arith.constant 0.000000e+00 : f32
      %96 = vector.broadcast %cst_47 : f32 to vector<2x125xf32>
      %97 = tpu.concatenate %74, %79, %84, %96 in 1 : vector<2x1xf32>, vector<2x1xf32>, vector<2x1xf32>, vector<2x125xf32> -> vector<2x128xf32>
      %98 = tpu.concatenate %33, %30, %31, %32, %26, %28, %95, %97 in 1 : vector<2x32xf32>, vector<2x32xf32>, vector<2x32xf32>, vector<2x32xf32>, vector<2x64xf32>, vector<2x64xf32>, vector<2x128xf32>, vector<2x128xf32> -> vector<2x512xf32>
      %c0_48 = arith.constant 0 : index
      %c0_49 = arith.constant 0 : index
      %99 = vector.load %arg9[%c0_48, %c0_49] : memref<2x512xf32, #tpu.memory_space<vmem>>, vector<2x512xf32>
      tpu.vector_store %arg9[%c0_48, %c0_49], %98 {strides = array<i32>} : memref<2x512xf32, #tpu.memory_space<vmem>>, vector<2x512xf32>,
    } else {
    }
    return
  }
  func.func @transform_0(%arg0: i32) -> (i32, i32) {
    %c0_i32 = arith.constant 0 : i32
    %c0_i32_0 = arith.constant 0 : i32
    return %c0_i32, %arg0 : i32, i32
  }
  func.func @transform_1(%arg0: i32) -> (i32, i32) {
    %c0_i32 = arith.constant 0 : i32
    %c0_i32_0 = arith.constant 0 : i32
    return %c0_i32, %arg0 : i32, i32
  }
  func.func @transform_2(%arg0: i32) -> (i32, i32) {
    %c0_i32 = arith.constant 0 : i32
    %c0_i32_0 = arith.constant 0 : i32
    return %arg0, %c0_i32 : i32, i32
  }
  func.func @transform_3(%arg0: i32) -> (i32, i32) {
    %c0_i32 = arith.constant 0 : i32
    %c0_i32_0 = arith.constant 0 : i32
    return %arg0, %c0_i32 : i32, i32
  }
  func.func @transform_4(%arg0: i32) -> (i32, i32) {
    %c0_i32 = arith.constant 0 : i32
    %c0_i32_0 = arith.constant 0 : i32
    %c0_i32_1 = arith.constant 0 : i32
    return %c0_i32, %c0_i32_0 : i32, i32
  }
  func.func @transform_5(%arg0: i32) -> (i32, i32) {
    %c0_i32 = arith.constant 0 : i32
    %c0_i32_0 = arith.constant 0 : i32
    %c0_i32_1 = arith.constant 0 : i32
    return %c0_i32, %c0_i32_0 : i32, i32
  }
  func.func @transform_6(%arg0: i32) -> (i32, i32) {
    %c0_i32 = arith.constant 0 : i32
    %c0_i32_0 = arith.constant 0 : i32
    %c0_i32_1 = arith.constant 0 : i32
    return %c0_i32, %c0_i32_0 : i32, i32
  }
  func.func @transform_7(%arg0: i32) -> (i32, i32) {
    %c0_i32 = arith.constant 0 : i32
    %c0_i32_0 = arith.constant 0 : i32
    %c0_i32_1 = arith.constant 0 : i32
    return %c0_i32, %c0_i32_0 : i32, i32
  }
  func.func @transform_8(%arg0: i32) -> (i32, i32) {
    %c0_i32 = arith.constant 0 : i32
    %c0_i32_0 = arith.constant 0 : i32
    %c0_i32_1 = arith.constant 0 : i32
    return %c0_i32, %c0_i32_0 : i32, i32
  }
}

</mosaic_0001>

<bundles_post_ra>
// kernel: dcnn_forward.1
= control target key start
LH: loop header
LB: loop body
LE: loop exit
PB: predicated region body
PF: predicated region fallthrough
CT: control target
= control target key end

     0   :  { %s4653_s27 = smov 0   ;;  %s5238_s0 = inlined_call_operand.vmem [shape: bf16[2,1024], index: 0, kind: input, shape index: {}]   ;;  %s5239_s1 = inlined_call_operand.vmem [shape: bf16[2,1024], index: 1, kind: input, shape index: {}]   ;;  %s5240_s2 = inlined_call_operand.vmem [shape: bf16[1024,640], index: 2, kind: input, shape index: {}]   ;;  %s5241_s3 = inlined_call_operand.vmem [shape: bf16[1024,640], index: 3, kind: input, shape index: {}]   ;;  %s5242_s4 = inlined_call_operand.vmem [shape: f32[1,640], index: 4, kind: input, shape index: {}]   ;;  %s5243_s5 = inlined_call_operand.vmem [shape: f32[1,640], index: 5, kind: input, shape index: {}]   ;;  %s5244_s6 = inlined_call_operand.vmem [shape: f32[128,128], index: 6, kind: input, shape index: {}]   ;;  %s5245_s7 = inlined_call_operand.vmem [shape: f32[1,128], index: 7, kind: input, shape index: {}]   ;;  %s5246_s8 = inlined_call_operand.vmem [shape: f32[2,512], index: 8, kind: output, shape index: {}]  }
   0x1 LB: > { %s4659_s28 = sadd.s32 4294967295, %s4596_s27   ;;  %p3601_p0 = scmp.ge.s32.totalorder %s4596_s27, 1  ;;  %s4596_s27 = sphi %s4653_s27, %s18_s27  }
   0x2   : > { %p291_p1 = scmp.lt.s32.totalorder %s4596_s27, 3 }
   0x4   : > { %p292_p2 = pnand %p3601_p0, %p291_p1 }
   0x5   : > { %s3602_s29 = sshll.u32 (!%p292_p2), %s4659_s28, 2  ;;  %s3604_s30 = sshll.u32 (!%p292_p2), %s4659_s28, 6 }
   0x6   : > { %295 = sbr.rel (%p292_p2) target bundleno = 1116 (0x45c), region = 52  ;;  %p336_p3 = scmp.lt.s32.totalorder (!%p292_p2), %s3602_s29, 7 }
   0x7   : > { %p346_p4 = scmp.lt.s32.totalorder (!%p292_p2), %s3604_s30, 127  ;;  %p3608_p5 = scmp.ne.s32.totalorder (!%p292_p2), %s4659_s28, 0 }
   0xd   : > { %s5248_s29 = smov (!%p336_p3, %s3602_s29), 7  ;;  %s5250_s30 = smov (!%p346_p4, %s3604_s30), 127 }
   0xe   : > { %s338_s11 = scalar_lea.vmem %s5238_s0, %s5248_s29  ;;  %s343_s14 = scalar_lea.vmem %s5239_s1, %s5248_s29  ;;  %v4598_v0 = vmov (!%p3608_p5), 0.0  }
   0xf   : > { %s4115_s15 = smul.u32 20, %s5250_s30  ;;  %364 = vst [vmem:[#allocation2] sm:$0xff] (!%p3608_p5), %v4598_v0  ;;  %365 = vst [vmem:[#allocation2 + $0x8] sm:$0x3] (!%p3608_p5), %v4598_v0 }
  0x10   : > { %363 = sbr.rel (%p3608_p5) target bundleno = 23 (0x17), region = 56  ;;  %366 = vst [vmem:[#allocation3] sm:$0xff] (!%p3608_p5), %v4598_v0  ;;  %367 = vst [vmem:[#allocation3 + $0x8] sm:$0x3] (!%p3608_p5), %v4598_v0 }
  0x11   : > { %s4678_s18 = scalar_lea.vmem %s5240_s2, %s4115_s15  ;;  %s4683_s21 = scalar_lea.vmem %s5241_s3, %s4115_s15 }
  0x17 PF: > { %v4134_v1 = vld [vmem:[%s4678_s18 + $0x4] ss:$20 sps:$4 sm:$0xff]   ;;  %v4136_v2 = vld [vmem:[%s4678_s18 + $0xc] ss:$20 sps:$4 sm:$0xff]   ;;  %v4139_v4 = vld [vmem:[%s4678_s18 + $0x8] ss:$20 sps:$4 sm:$0xff]   ;;  %v575_v41 = vlaneseq }
  0x18   : > { %1424 = vmatprep.subr.bf16.mxu0 %v4134_v1  ;;  %v4138_v3 = vld [vmem:[%s4678_s18] ss:$20 sps:$4 sm:$0xff]   ;;  %1506 = vmatprep.subr.bf16.mxu1 %v4136_v2  ;;  %v4144_v7 = vld [vmem:[%s4678_s18 + $0x28] ss:$20 sps:$4 sm:$0xff]   ;;  %v4145_v8 = vld [vmem:[%s4678_s18 + $0x30] ss:$20 sps:$4 sm:$0xff]  }
  0x19   : > { %v4140_v5 = vld [vmem:[%s4678_s18 + $0x2c] ss:$20 sps:$4 sm:$0xff]   ;;  %1425 = vmatpush1.bf16.msra.mxu0 %v4138_v3  ;;  %1507 = vmatpush1.bf16.msra.mxu1 %v4139_v4  ;;  %v4142_v6 = vld [vmem:[%s4678_s18 + $0x34] ss:$20 sps:$4 sm:$0xff]   ;;  %v4148_v10 = vld [vmem:[%s4678_s18 + $0x5c] ss:$20 sps:$4 sm:$0xff]  }
  0x1a   : > { %1426 = vmatprep.subr.bf16.mxu0 %v4140_v5  ;;  %1508 = vmatprep.subr.bf16.mxu1 %v4142_v6  ;;  %v4146_v9 = vld [vmem:[%s4678_s18 + $0x54] ss:$20 sps:$4 sm:$0xff]   ;;  %v4150_v11 = vld [vmem:[%s4678_s18 + $0x50] ss:$20 sps:$4 sm:$0xff]   ;;  %v4151_v12 = vld [vmem:[%s4678_s18 + $0x58] ss:$20 sps:$4 sm:$0xff]  }
  0x1b   : > { %v4152_v13 = vld [vmem:[%s4678_s18 + $0x7c] ss:$20 sps:$4 sm:$0xff]   ;;  %v4154_v14 = vld [vmem:[%s4678_s18 + $0x84] ss:$20 sps:$4 sm:$0xff]   ;;  %v4157_v16 = vld [vmem:[%s4678_s18 + $0x80] ss:$20 sps:$4 sm:$0xff]  }
  0x1c   : > { %v4156_v15 = vld [vmem:[%s4678_s18 + $0x78] ss:$20 sps:$4 sm:$0xff]   ;;  %v4162_v19 = vld [vmem:[%s4678_s18 + $0xa0] ss:$20 sps:$4 sm:$0xff]   ;;  %v4163_v20 = vld [vmem:[%s4678_s18 + $0xa8] ss:$20 sps:$4 sm:$0xff]  }
  0x1d   : > { %1427 = vmatpush1.bf16.msra.mxu0 %v4144_v7  ;;  %1509 = vmatpush1.bf16.msra.mxu1 %v4145_v8  ;;  %v4158_v17 = vld [vmem:[%s4678_s18 + $0xa4] ss:$20 sps:$4 sm:$0xff]   ;;  %v4160_v18 = vld [vmem:[%s4678_s18 + $0xac] ss:$20 sps:$4 sm:$0xff]   ;;  %v4166_v22 = vld [vmem:[%s4678_s18 + $0xd4] ss:$20 sps:$4 sm:$0xff]  }
  0x1e   : > { %1428 = vmatprep.subr.bf16.mxu0 %v4146_v9  ;;  %1510 = vmatprep.subr.bf16.mxu1 %v4148_v10  ;;  %v4164_v21 = vld [vmem:[%s4678_s18 + $0xcc] ss:$20 sps:$4 sm:$0xff]   ;;  %v4168_v23 = vld [vmem:[%s4678_s18 + $0xc8] ss:$20 sps:$4 sm:$0xff]   ;;  %v4169_v24 = vld [vmem:[%s4678_s18 + $0xd0] ss:$20 sps:$4 sm:$0xff]  }
  0x1f   : > { %v4170_v25 = vld [vmem:[%s4678_s18 + $0xf4] ss:$20 sps:$4 sm:$0xff]   ;;  %v4172_v26 = vld [vmem:[%s4678_s18 + $0xfc] ss:$20 sps:$4 sm:$0xff]   ;;  %v4175_v28 = vld [vmem:[%s4678_s18 + $0xf8] ss:$20 sps:$4 sm:$0xff]  }
  0x20   : > { %v4174_v27 = vld [vmem:[%s4678_s18 + $0xf0] ss:$20 sps:$4 sm:$0xff]   ;;  %v4180_v31 = vld [vmem:[%s4678_s18 + $0x118] ss:$20 sps:$4 sm:$0xff]   ;;  %v4181_v32 = vld [vmem:[%s4678_s18 + $0x120] ss:$20 sps:$4 sm:$0xff]  }
  0x21   : > { %1429 = vmatpush1.bf16.msra.mxu0 %v4150_v11  ;;  %1511 = vmatpush1.bf16.msra.mxu1 %v4151_v12  ;;  %v4176_v29 = vld [vmem:[%s4678_s18 + $0x11c] ss:$20 sps:$4 sm:$0xff]   ;;  %v4178_v30 = vld [vmem:[%s4678_s18 + $0x124] ss:$20 sps:$4 sm:$0xff]   ;;  %v4184_v34 = vld [vmem:[%s4678_s18 + $0x14c] ss:$20 sps:$4 sm:$0xff]  }
  0x22   : > { %1430 = vmatprep.subr.bf16.mxu0 %v4152_v13  ;;  %1512 = vmatprep.subr.bf16.mxu1 %v4154_v14  ;;  %v4182_v33 = vld [vmem:[%s4678_s18 + $0x144] ss:$20 sps:$4 sm:$0xff]   ;;  %v4186_v35 = vld [vmem:[%s4678_s18 + $0x140] ss:$20 sps:$4 sm:$0xff]   ;;  %v4187_v36 = vld [vmem:[%s4678_s18 + $0x148] ss:$20 sps:$4 sm:$0xff]  }
  0x23   : > { %v4188_v37 = vld [vmem:[%s4678_s18 + $0x16c] ss:$20 sps:$4 sm:$0xff]   ;;  %v4190_v38 = vld [vmem:[%s4678_s18 + $0x174] ss:$20 sps:$4 sm:$0xff]   ;;  %v4599_v39 = vmov 1966171168  }
  0x24   : > { %v573_v40 = vunpack.c.l.s4 %v4599_v39  ;;  %v4192_v42 = vld [vmem:[%s4678_s18 + $0x168] ss:$20 sps:$4 sm:$0xff]   ;;  %v4193_v43 = vld [vmem:[%s4678_s18 + $0x170] ss:$20 sps:$4 sm:$0xff]   ;;  %v4728_v47 = vshrl.u32 %v575_v41, 7  ;;  %p3931_p6 = scmp.ne.s32.totalorder %s4659_s28, 1 }
  0x25   : > { %1431 = vmatpush1.bf16.msra.mxu0 %v4156_v15  ;;  %1513 = vmatpush1.bf16.msra.mxu1 %v4157_v16  ;;  %v4194_v44 = vld [vmem:[%s4678_s18 + $0x194] ss:$20 sps:$4 sm:$0xff]   ;;  %v4196_v45 = vld [vmem:[%s4678_s18 + $0x19c] ss:$20 sps:$4 sm:$0xff]   ;;  %v4199_v49 = vld [vmem:[%s4678_s18 + $0x198] ss:$20 sps:$4 sm:$0xff]  }
  0x26   : > { %1432 = vmatprep.subr.bf16.mxu0 %v4158_v17  ;;  %1514 = vmatprep.subr.bf16.mxu1 %v4160_v18  ;;  %v574_v46 = vunpack.c.0.s8 %v573_v40  ;;  %v4198_v48 = vld [vmem:[%s4678_s18 + $0x190] ss:$20 sps:$4 sm:$0xff]   ;;  %v3609_v53 = vld.sshfl [vmem:[%s338_s11] sm:$0x33 pattern:$0x75316420] }
  0x27   : > { %v4200_v50 = vld [vmem:[%s4678_s18 + $0x1bc] ss:$20 sps:$4 sm:$0xff]   ;;  %v4202_v51 = vld [vmem:[%s4678_s18 + $0x1c4] ss:$20 sps:$4 sm:$0xff]   ;;  %v4205_v55 = vld [vmem:[%s4678_s18 + $0x1c0] ss:$20 sps:$4 sm:$0xff]   ;;  %v571_v56 = vcombine.high %v3609_v53, %v3609_v53 }
  0x28   : > { %v4735_v52 = vsub.s32 %v574_v46, %v4728_v47  ;;  %v4204_v54 = vld [vmem:[%s4678_s18 + $0x1b8] ss:$20 sps:$4 sm:$0xff]   ;;  %v4210_v60 = vld [vmem:[%s4678_s18 + $0x1e0] ss:$20 sps:$4 sm:$0xff]   ;;  %v4211_v61 = vld [vmem:[%s4678_s18 + $0x1e8] ss:$20 sps:$4 sm:$0xff]  }
  0x29   : > { %1433 = vmatpush1.bf16.msra.mxu0 %v4162_v19  ;;  %1515 = vmatpush1.bf16.msra.mxu1 %v4163_v20  ;;  %v4206_v57 = vld [vmem:[%s4678_s18 + $0x1e4] ss:$20 sps:$4 sm:$0xff]   ;;  %v4208_v58 = vld [vmem:[%s4678_s18 + $0x1ec] ss:$20 sps:$4 sm:$0xff]   ;;  %v4214_v63 = vld [vmem:[%s4678_s18 + $0x214] ss:$20 sps:$4 sm:$0xff]  }
  0x2a   : > { %1434 = vmatprep.subr.bf16.mxu0 %v4164_v21  ;;  %1516 = vmatprep.subr.bf16.mxu1 %v4166_v22  ;;  %v4747_v59 = vrot.slane %v571_v56, %v4735_v52  ;;  %v4212_v62 = vld [vmem:[%s4678_s18 + $0x20c] ss:$20 sps:$4 sm:$0xff]   ;;  %v4216_v0 = vld [vmem:[%s4678_s18 + $0x208] ss:$20 sps:$4 sm:$0xff]   ;;  %v4217_v1 = vld [vmem:[%s4678_s18 + $0x210] ss:$20 sps:$4 sm:$0xff]   ;;  %v4769_v13 = vrot.slane %v3609_v53, %v4735_v52 }
  0x2b   : > { %v4218_v2 = vld [vmem:[%s4678_s18 + $0x234] ss:$20 sps:$4 sm:$0xff]   ;;  %v4220_v3 = vld [vmem:[%s4678_s18 + $0x23c] ss:$20 sps:$4 sm:$0xff]   ;;  %v4223_v5 = vld [vmem:[%s4678_s18 + $0x238] ss:$20 sps:$4 sm:$0xff]  }
  0x2c   : > { %1456 = vmatprep.mubr.bf16.mxu0 %v4747_v59  ;;  %1538 = vmatprep.mubr.bf16.mxu1 %v4747_v59  ;;  %v4222_v4 = vld [vmem:[%s4678_s18 + $0x230] ss:$20 sps:$4 sm:$0xff]   ;;  %v4228_v8 = vld [vmem:[%s4678_s18 + $0x258] ss:$20 sps:$4 sm:$0xff]   ;;  %v4229_v9 = vld [vmem:[%s4678_s18 + $0x260] ss:$20 sps:$4 sm:$0xff]   ;;  %v4776_v17 = vcombine.high %v4747_v59, %v4747_v59 }
  0x2d   : > { %1435 = vmatpush1.bf16.msra.mxu0 %v4168_v23  ;;  %1517 = vmatpush1.bf16.msra.mxu1 %v4169_v24  ;;  %v4224_v6 = vld [vmem:[%s4678_s18 + $0x25c] ss:$20 sps:$4 sm:$0xff]   ;;  %v4226_v7 = vld [vmem:[%s4678_s18 + $0x264] ss:$20 sps:$4 sm:$0xff]   ;;  %v4235_v11 = vld [vmem:[%s4678_s18 + $0x28c] ss:$20 sps:$4 sm:$0xff]  }
  0x2e   : > { %1436 = vmatprep.subr.bf16.mxu0 %v4170_v25  ;;  %1518 = vmatprep.subr.bf16.mxu1 %v4172_v26  ;;  %v4232_v10 = vld [vmem:[%s4678_s18 + $0x284] ss:$20 sps:$4 sm:$0xff]   ;;  %v4230_v12 = vld [vmem:[%s4678_s18 + $0x280] ss:$20 sps:$4 sm:$0xff]   ;;  %v4233_v14 = vld [vmem:[%s4678_s18 + $0x288] ss:$20 sps:$4 sm:$0xff]  }
  0x2f   : > { %v4238_v15 = vld [vmem:[%s4678_s18 + $0x2ac] ss:$20 sps:$4 sm:$0xff]   ;;  %v4241_v16 = vld [vmem:[%s4678_s18 + $0x2b4] ss:$20 sps:$4 sm:$0xff]   ;;  %v4239_v19 = vld [vmem:[%s4678_s18 + $0x2b0] ss:$20 sps:$4 sm:$0xff]  }
  0x30   : > { %v4236_v18 = vld [vmem:[%s4678_s18 + $0x2a8] ss:$20 sps:$4 sm:$0xff]   ;;  %v4242_v22 = vld [vmem:[%s4678_s18 + $0x2d0] ss:$20 sps:$4 sm:$0xff]   ;;  %v4245_v23 = vld [vmem:[%s4678_s18 + $0x2d8] ss:$20 sps:$4 sm:$0xff]  }
  0x31   : > { %1437 = vmatpush1.bf16.msra.mxu0 %v4174_v27  ;;  %1519 = vmatpush1.bf16.msra.mxu1 %v4175_v28  ;;  %v4244_v20 = vld [vmem:[%s4678_s18 + $0x2d4] ss:$20 sps:$4 sm:$0xff]   ;;  %v4247_v21 = vld [vmem:[%s4678_s18 + $0x2dc] ss:$20 sps:$4 sm:$0xff]   ;;  %v4253_v25 = vld [vmem:[%s4678_s18 + $0x304] ss:$20 sps:$4 sm:$0xff]  }
  0x32   : > { %1438 = vmatprep.subr.bf16.mxu0 %v4176_v29  ;;  %1520 = vmatprep.subr.bf16.mxu1 %v4178_v30  ;;  %v4250_v24 = vld [vmem:[%s4678_s18 + $0x2fc] ss:$20 sps:$4 sm:$0xff]   ;;  %v4248_v26 = vld [vmem:[%s4678_s18 + $0x2f8] ss:$20 sps:$4 sm:$0xff]   ;;  %v4251_v27 = vld [vmem:[%s4678_s18 + $0x300] ss:$20 sps:$4 sm:$0xff]  }
  0x33   : > { %v4256_v28 = vld [vmem:[%s4678_s18 + $0x324] ss:$20 sps:$4 sm:$0xff]   ;;  %v4259_v29 = vld [vmem:[%s4678_s18 + $0x32c] ss:$20 sps:$4 sm:$0xff]   ;;  %v4274_v40 = vld [vmem:[%s4678_s18 + $0x39c] ss:$20 sps:$4 sm:$0xff]  }
  0x34   : > { %v4254_v30 = vld [vmem:[%s4678_s18 + $0x320] ss:$20 sps:$4 sm:$0xff]   ;;  %v4269_v39 = vld [vmem:[%s4678_s18 + $0x378] ss:$20 sps:$4 sm:$0xff]   ;;  %v4287_v53 = vld [vmem:[%s4678_s18 + $0x3f0] ss:$20 sps:$4 sm:$0xff]  }
  0x35   : > { %1439 = vmatpush1.bf16.msra.mxu0 %v4180_v31  ;;  %1521 = vmatpush1.bf16.msra.mxu1 %v4181_v32  ;;  %v4257_v31 = vld [vmem:[%s4678_s18 + $0x328] ss:$20 sps:$4 sm:$0xff]   ;;  %v4262_v32 = vld [vmem:[%s4678_s18 + $0x34c] ss:$20 sps:$4 sm:$0xff]   ;;  %v4277_v41 = vld [vmem:[%s4678_s18 + $0x3a4] ss:$20 sps:$4 sm:$0xff]  }
  0x36   : > { %1440 = vmatprep.subr.bf16.mxu0 %v4182_v33  ;;  %1522 = vmatprep.subr.bf16.mxu1 %v4184_v34  ;;  %v4265_v33 = vld [vmem:[%s4678_s18 + $0x354] ss:$20 sps:$4 sm:$0xff]   ;;  %v4290_v56 = vld [vmem:[%s4678_s18 + $0x410] ss:$20 sps:$4 sm:$0xff]   ;;  %s4601_s28 = smov (!%p3931_p6), 64   ;;  %vm4603_vm0 = vmmov (!%p3931_p6), 0  }
  0x37   : > { %v4260_v34 = vld [vmem:[%s4678_s18 + $0x348] ss:$20 sps:$4 sm:$0xff]   ;;  %v4278_v46 = vld [vmem:[%s4678_s18 + $0x3c0] ss:$20 sps:$4 sm:$0xff]   ;;  %vm3157_vm1 = vcmask (!%p3931_p6), 523264   ;;  %vm3155_vm2 = vcmask (!%p3931_p6), 1041408  }
  0x38   : > { %s4607_s22 = smov (!%p3931_p6), 32   ;;  %vm3493_vm3 = vcmask (!%p3931_p6), 7168   ;;  %vm3495_vm4 = vcmask (!%p3931_p6), 15360   ;;  %vm3497_vm5 = vcmask (!%p3931_p6), 23552   ;;  %vm3512_vm7 = vcmask (!%p3931_p6), 261120  }
  0x39   : > { %1441 = vmatpush1.bf16.msra.mxu0 %v4186_v35  ;;  %1523 = vmatpush1.bf16.msra.mxu1 %v4187_v36  ;;  %v4263_v35 = vld [vmem:[%s4678_s18 + $0x350] ss:$20 sps:$4 sm:$0xff]   ;;  %v4268_v36 = vld [vmem:[%s4678_s18 + $0x374] ss:$20 sps:$4 sm:$0xff]   ;;  %vm3515_vm8 = vcmask (!%p3931_p6), 785408  }
  0x3a   : > { %1442 = vmatprep.subr.bf16.mxu0 %v4188_v37  ;;  %1524 = vmatprep.subr.bf16.mxu1 %v4190_v38  ;;  %v4271_v37 = vld [vmem:[%s4678_s18 + $0x37c] ss:$20 sps:$4 sm:$0xff]  }
  0x3b   : > { %v4266_v38 = vld [vmem:[%s4678_s18 + $0x370] ss:$20 sps:$4 sm:$0xff]  }
  0x3d   : > { %1443 = vmatpush1.bf16.msra.mxu0 %v4192_v42  ;;  %1525 = vmatpush1.bf16.msra.mxu1 %v4193_v43  ;;  %v4272_v42 = vld [vmem:[%s4678_s18 + $0x398] ss:$20 sps:$4 sm:$0xff]   ;;  %v4275_v43 = vld [vmem:[%s4678_s18 + $0x3a0] ss:$20 sps:$4 sm:$0xff]  }
  0x3e   : > { %1444 = vmatprep.subr.bf16.mxu0 %v4194_v44  ;;  %1526 = vmatprep.subr.bf16.mxu1 %v4196_v45  ;;  %v4280_v44 = vld [vmem:[%s4678_s18 + $0x3c4] ss:$20 sps:$4 sm:$0xff]   ;;  %v4283_v45 = vld [vmem:[%s4678_s18 + $0x3cc] ss:$20 sps:$4 sm:$0xff]  }
  0x41   : > { %1445 = vmatpush1.bf16.msra.mxu0 %v4198_v48  ;;  %1527 = vmatpush1.bf16.msra.mxu1 %v4199_v49  ;;  %v4281_v48 = vld [vmem:[%s4678_s18 + $0x3c8] ss:$20 sps:$4 sm:$0xff]   ;;  %v4286_v49 = vld [vmem:[%s4678_s18 + $0x3ec] ss:$20 sps:$4 sm:$0xff]  }
  0x42   : > { %1446 = vmatprep.subr.bf16.mxu0 %v4200_v50  ;;  %1528 = vmatprep.subr.bf16.mxu1 %v4202_v51  ;;  %v4289_v50 = vld [vmem:[%s4678_s18 + $0x3f4] ss:$20 sps:$4 sm:$0xff]  }
  0x43   : > { %v4284_v51 = vld [vmem:[%s4678_s18 + $0x3e8] ss:$20 sps:$4 sm:$0xff]  }
  0x45   : > { %1447 = vmatpush1.bf16.msra.mxu0 %v4204_v54  ;;  %1529 = vmatpush1.bf16.msra.mxu1 %v4205_v55  ;;  %v4292_v54 = vld [vmem:[%s4678_s18 + $0x414] ss:$20 sps:$4 sm:$0xff]   ;;  %v4295_v55 = vld [vmem:[%s4678_s18 + $0x41c] ss:$20 sps:$4 sm:$0xff]  }
  0x46   : > { %1448 = vmatprep.subr.bf16.mxu0 %v4206_v57  ;;  %1530 = vmatprep.subr.bf16.mxu1 %v4208_v58  ;;  %v4293_v57 = vld [vmem:[%s4678_s18 + $0x418] ss:$20 sps:$4 sm:$0xff]   ;;  %v4298_v58 = vld [vmem:[%s4678_s18 + $0x43c] ss:$20 sps:$4 sm:$0xff]  }
  0x49   : > { %1449 = vmatpush1.bf16.msra.mxu0 %v4210_v60  ;;  %1531 = vmatpush1.bf16.msra.mxu1 %v4211_v61  ;;  %v4301_v60 = vld [vmem:[%s4678_s18 + $0x444] ss:$20 sps:$4 sm:$0xff]  }
  0x4a   : > { %1450 = vmatprep.subr.bf16.mxu0 %v4212_v62  ;;  %1532 = vmatprep.subr.bf16.mxu1 %v4214_v63  ;;  %v4296_v61 = vld [vmem:[%s4678_s18 + $0x438] ss:$20 sps:$4 sm:$0xff]   ;;  %v4299_v62 = vld [vmem:[%s4678_s18 + $0x440] ss:$20 sps:$4 sm:$0xff]  }
  0x4b   : > { %v4304_v63 = vld [vmem:[%s4678_s18 + $0x464] ss:$20 sps:$4 sm:$0xff]  }
  0x4d   : > { %1451 = vmatpush1.bf16.msra.mxu0 %v4216_v0  ;;  %1533 = vmatpush1.bf16.msra.mxu1 %v4217_v1  ;;  %v4307_v0 = vld [vmem:[%s4678_s18 + $0x46c] ss:$20 sps:$4 sm:$0xff]  }
  0x4e   : > { %1452 = vmatprep.subr.bf16.mxu0 %v4218_v2  ;;  %1534 = vmatprep.subr.bf16.mxu1 %v4220_v3  ;;  %v4302_v1 = vld [vmem:[%s4678_s18 + $0x460] ss:$20 sps:$4 sm:$0xff]   ;;  %v4305_v2 = vld [vmem:[%s4678_s18 + $0x468] ss:$20 sps:$4 sm:$0xff]  }
  0x4f   : > { %v4310_v3 = vld [vmem:[%s4678_s18 + $0x48c] ss:$20 sps:$4 sm:$0xff]  }
  0x51   : > { %1453 = vmatpush1.bf16.msra.mxu0 %v4222_v4  ;;  %1535 = vmatpush1.bf16.msra.mxu1 %v4223_v5  ;;  %v4313_v4 = vld [vmem:[%s4678_s18 + $0x494] ss:$20 sps:$4 sm:$0xff]  }
  0x52   : > { %1454 = vmatprep.subr.bf16.mxu0 %v4224_v6  ;;  %1536 = vmatprep.subr.bf16.mxu1 %v4226_v7  ;;  %v4308_v5 = vld [vmem:[%s4678_s18 + $0x488] ss:$20 sps:$4 sm:$0xff]   ;;  %v4311_v6 = vld [vmem:[%s4678_s18 + $0x490] ss:$20 sps:$4 sm:$0xff]  }
  0x53   : > { %v4316_v7 = vld [vmem:[%s4678_s18 + $0x4b4] ss:$20 sps:$4 sm:$0xff]  }
  0x55   : > { %1455 = vmatpush1.bf16.msra.mxu0 %v4228_v8  ;;  %1537 = vmatpush1.bf16.msra.mxu1 %v4229_v9  ;;  %v4319_v8 = vld [vmem:[%s4678_s18 + $0x4bc] ss:$20 sps:$4 sm:$0xff]  }
  0x56   : > { %1465 = vmatprep.subr.bf16.mxu0 %v4232_v10  ;;  %1547 = vmatprep.subr.bf16.mxu1 %v4235_v11  ;;  %v4314_v9 = vld [vmem:[%s4678_s18 + $0x4b0] ss:$20 sps:$4 sm:$0xff]   ;;  %v4317_v10 = vld [vmem:[%s4678_s18 + $0x4b8] ss:$20 sps:$4 sm:$0xff]  }
  0x57   : > { %v4322_v11 = vld [vmem:[%s4678_s18 + $0x4dc] ss:$20 sps:$4 sm:$0xff]  }
  0x58   : > { %1457 = vmatmul.mubr.bf16.vlgmr.msra.gmra.mrb[0].mxu0 %v4769_v13  ;;  %1539 = vmatmul.mubr.bf16.vlgmr.msra.gmra.mrb[0].mxu1 %v4769_v13 }
  0x59   : > { %1466 = vmatpush1.bf16.msra.mxu0 %v4230_v12  ;;  %1548 = vmatpush1.bf16.msra.mxu1 %v4233_v14  ;;  %v4325_v12 = vld [vmem:[%s4678_s18 + $0x4e4] ss:$20 sps:$4 sm:$0xff]  }
  0x5a   : > { %1467 = vmatprep.subr.bf16.mxu0 %v4238_v15  ;;  %1549 = vmatprep.subr.bf16.mxu1 %v4241_v16  ;;  %v4320_v14 = vld [vmem:[%s4678_s18 + $0x4d8] ss:$20 sps:$4 sm:$0xff]   ;;  %v4323_v15 = vld [vmem:[%s4678_s18 + $0x4e0] ss:$20 sps:$4 sm:$0xff]   ;;  %v4326_v16 = vld [vmem:[%s4678_s18 + $0x150] ss:$20 sps:$4 sm:$0xff]  }
  0x5b   : > { %1497 = vmatprep.mubr.bf16.mxu0 %v4776_v17  ;;  %1579 = vmatprep.mubr.bf16.mxu1 %v4776_v17 }
  0x5d   : > { %1468 = vmatpush1.bf16.msra.mxu0 %v4236_v18  ;;  %1550 = vmatpush1.bf16.msra.mxu1 %v4239_v19  ;;  %v4327_v18 = vld [vmem:[%s4678_s18 + $0x3d0] ss:$20 sps:$4 sm:$0xff]   ;;  %v4844_v19 = vcombine.high %v4769_v13, %v4769_v13 }
  0x5e   : > { %1469 = vmatprep.subr.bf16.mxu0 %v4244_v20  ;;  %1551 = vmatprep.subr.bf16.mxu1 %v4247_v21  ;;  %v4328_v20 = vld [vmem:[%s4678_s18 + $0x10] ss:$20 sps:$4 sm:$0xff]  }
  0x5f   : > { %v4329_v21 = vld [vmem:[%s4678_s18 + $0x290] ss:$20 sps:$4 sm:$0xff]  }
  0x61   : > { %1470 = vmatpush1.bf16.msra.mxu0 %v4242_v22  ;;  %1552 = vmatpush1.bf16.msra.mxu1 %v4245_v23  ;;  %v4330_v22 = vld [vmem:[%s4678_s18 + $0x178] ss:$20 sps:$4 sm:$0xff]  }
  0x62   : > { %1471 = vmatprep.subr.bf16.mxu0 %v4250_v24  ;;  %1553 = vmatprep.subr.bf16.mxu1 %v4253_v25  ;;  %v4331_v23 = vld [vmem:[%s4678_s18 + $0x3f8] ss:$20 sps:$4 sm:$0xff]  }
  0x63   : > { %v4332_v24 = vld [vmem:[%s4678_s18 + $0x38] ss:$20 sps:$4 sm:$0xff]  }
  0x64   : > { %v4333_v25 = vld [vmem:[%s4678_s18 + $0x2b8] ss:$20 sps:$4 sm:$0xff]  }
  0x65   : > { %1472 = vmatpush1.bf16.msra.mxu0 %v4248_v26  ;;  %1554 = vmatpush1.bf16.msra.mxu1 %v4251_v27  ;;  %v4334_v26 = vld [vmem:[%s4678_s18 + $0x1a0] ss:$20 sps:$4 sm:$0xff]  }
  0x66   : > { %1473 = vmatprep.subr.bf16.mxu0 %v4256_v28  ;;  %1555 = vmatprep.subr.bf16.mxu1 %v4259_v29  ;;  %v4335_v27 = vld [vmem:[%s4678_s18 + $0x420] ss:$20 sps:$4 sm:$0xff]  }
  0x67   : > { %v4336_v28 = vld [vmem:[%s4678_s18 + $0x60] ss:$20 sps:$4 sm:$0xff]  }
  0x68   : > { %v4337_v29 = vld [vmem:[%s4678_s18 + $0x2e0] ss:$20 sps:$4 sm:$0xff]  }
  0x69   : > { %1474 = vmatpush1.bf16.msra.mxu0 %v4254_v30  ;;  %1556 = vmatpush1.bf16.msra.mxu1 %v4257_v31  ;;  %v4338_v30 = vld [vmem:[%s4678_s18 + $0x1c8] ss:$20 sps:$4 sm:$0xff]  }
  0x6a   : > { %1475 = vmatprep.subr.bf16.mxu0 %v4262_v32  ;;  %1557 = vmatprep.subr.bf16.mxu1 %v4265_v33  ;;  %v4339_v31 = vld [vmem:[%s4678_s18 + $0x448] ss:$20 sps:$4 sm:$0xff]   ;;  %v4343_v33 = vld [vmem:[%s4678_s18 + $0x470] ss:$20 sps:$4 sm:$0xff]  }
  0x6b   : > { %v4340_v32 = vld [vmem:[%s4678_s18 + $0x88] ss:$20 sps:$4 sm:$0xff]  }
  0x6d   : > { %1476 = vmatpush1.bf16.msra.mxu0 %v4260_v34  ;;  %1558 = vmatpush1.bf16.msra.mxu1 %v4263_v35  ;;  %v4344_v34 = vld [vmem:[%s4678_s18 + $0xb0] ss:$20 sps:$4 sm:$0xff]  }
  0x6e   : > { %1477 = vmatprep.subr.bf16.mxu0 %v4268_v36  ;;  %1559 = vmatprep.subr.bf16.mxu1 %v4271_v37  ;;  %v4345_v35 = vld [vmem:[%s4678_s18 + $0x330] ss:$20 sps:$4 sm:$0xff]   ;;  %v4346_v36 = vld [vmem:[%s4678_s18 + $0x218] ss:$20 sps:$4 sm:$0xff]  }
  0x6f   : > { %v4347_v37 = vld [vmem:[%s4678_s18 + $0x498] ss:$20 sps:$4 sm:$0xff]  }
  0x71   : > { %1478 = vmatpush1.bf16.msra.mxu0 %v4266_v38  ;;  %1560 = vmatpush1.bf16.msra.mxu1 %v4269_v39  ;;  %v4348_v38 = vld [vmem:[%s4678_s18 + $0xd8] ss:$20 sps:$4 sm:$0xff]  }
  0x72   : > { %1479 = vmatprep.subr.bf16.mxu0 %v4274_v40  ;;  %1561 = vmatprep.subr.bf16.mxu1 %v4277_v41  ;;  %v4349_v39 = vld [vmem:[%s4678_s18 + $0x358] ss:$20 sps:$4 sm:$0xff]   ;;  %v4350_v40 = vld [vmem:[%s4678_s18 + $0x240] ss:$20 sps:$4 sm:$0xff]  }
  0x73   : > { %v4351_v41 = vld [vmem:[%s4678_s18 + $0x4c0] ss:$20 sps:$4 sm:$0xff]  }
  0x75   : > { %1480 = vmatpush1.bf16.msra.mxu0 %v4272_v42  ;;  %1562 = vmatpush1.bf16.msra.mxu1 %v4275_v43  ;;  %v4352_v42 = vld [vmem:[%s4678_s18 + $0x100] ss:$20 sps:$4 sm:$0xff]  }
  0x76   : > { %1481 = vmatprep.subr.bf16.mxu0 %v4280_v44  ;;  %1563 = vmatprep.subr.bf16.mxu1 %v4283_v45  ;;  %v4353_v43 = vld [vmem:[%s4678_s18 + $0x380] ss:$20 sps:$4 sm:$0xff]   ;;  %v4354_v44 = vld [vmem:[%s4678_s18 + $0x268] ss:$20 sps:$4 sm:$0xff]  }
  0x77   : > { %v4355_v45 = vld [vmem:[%s4678_s18 + $0x4e8] ss:$20 sps:$4 sm:$0xff]  }
  0x79   : > { %1482 = vmatpush1.bf16.msra.mxu0 %v4278_v46  ;;  %1564 = vmatpush1.bf16.msra.mxu1 %v4281_v48  ;;  %v4356_v46 = vld [vmem:[%s4678_s18 + $0x128] ss:$20 sps:$4 sm:$0xff]  }
  0x7a   : > { %1483 = vmatprep.subr.bf16.mxu0 %v4286_v49  ;;  %1565 = vmatprep.subr.bf16.mxu1 %v4289_v50  ;;  %v4357_v48 = vld [vmem:[%s4678_s18 + $0x3a8] ss:$20 sps:$4 sm:$0xff]   ;;  %v4360_v49 = vld [vmem:[%s4683_s21 + $0x4] ss:$20 sps:$4 sm:$0xff]   ;;  %v4363_v50 = vld [vmem:[%s4683_s21 + $0xc] ss:$20 sps:$4 sm:$0xff]  }
  0x7d   : > { %1484 = vmatpush1.bf16.msra.mxu0 %v4284_v51  ;;  %1566 = vmatpush1.bf16.msra.mxu1 %v4287_v53  ;;  %v4358_v51 = vld [vmem:[%s4683_s21] ss:$20 sps:$4 sm:$0xff]   ;;  %v4361_v53 = vld [vmem:[%s4683_s21 + $0x8] ss:$20 sps:$4 sm:$0xff]  }
  0x7e   : > { %1485 = vmatprep.subr.bf16.mxu0 %v4292_v54  ;;  %1567 = vmatprep.subr.bf16.mxu1 %v4295_v55  ;;  %v4366_v54 = vld [vmem:[%s4683_s21 + $0x2c] ss:$20 sps:$4 sm:$0xff]  }
  0x7f   : > { %v4890_v55 = vld.sshfl [vmem:[%s343_s14] sm:$0x33 pattern:$0x75316420] }
  0x81   : > { %1486 = vmatpush1.bf16.msra.mxu0 %v4290_v56  ;;  %1568 = vmatpush1.bf16.msra.mxu1 %v4293_v57  ;;  %v4369_v56 = vld [vmem:[%s4683_s21 + $0x34] ss:$20 sps:$4 sm:$0xff]   ;;  %v1906_v57 = vcombine.high %v4890_v55, %v4890_v55 }
  0x82   : > { %1487 = vmatprep.subr.bf16.mxu0 %v4298_v58  ;;  %1569 = vmatprep.subr.bf16.mxu1 %v4301_v60  ;;  %v4364_v58 = vld [vmem:[%s4683_s21 + $0x28] ss:$20 sps:$4 sm:$0xff]  }
  0x83   : > { %v4899_v60 = vrot.slane %v1906_v57, %v4735_v52  ;;  %v4459_v57 = vld [vmem:[%s4683_s21 + $0x28c] ss:$20 sps:$4 sm:$0xff]  }
  0x85   : > { %1488 = vmatpush1.bf16.msra.mxu0 %v4296_v61  ;;  %1570 = vmatpush1.bf16.msra.mxu1 %v4299_v62  ;;  %v4367_v61 = vld [vmem:[%s4683_s21 + $0x30] ss:$20 sps:$4 sm:$0xff]   ;;  %v4372_v62 = vld [vmem:[%s4683_s21 + $0x54] ss:$20 sps:$4 sm:$0xff]  }
  0x86   : > { %1489 = vmatprep.subr.bf16.mxu0 %v4304_v63  ;;  %1571 = vmatprep.subr.bf16.mxu1 %v4307_v0  ;;  %v4375_v63 = vld [vmem:[%s4683_s21 + $0x5c] ss:$20 sps:$4 sm:$0xff]   ;;  %v4373_v0 = vld [vmem:[%s4683_s21 + $0x58] ss:$20 sps:$4 sm:$0xff]  }
  0x89   : > { %1490 = vmatpush1.bf16.msra.mxu0 %v4302_v1  ;;  %1572 = vmatpush1.bf16.msra.mxu1 %v4305_v2  ;;  %v4378_v1 = vld [vmem:[%s4683_s21 + $0x7c] ss:$20 sps:$4 sm:$0xff]   ;;  %v4381_v2 = vld [vmem:[%s4683_s21 + $0x84] ss:$20 sps:$4 sm:$0xff]  }
  0x8a   : > { %1491 = vmatprep.subr.bf16.mxu0 %v4310_v3  ;;  %1573 = vmatprep.subr.bf16.mxu1 %v4313_v4  ;;  %v4376_v3 = vld [vmem:[%s4683_s21 + $0x78] ss:$20 sps:$4 sm:$0xff]   ;;  %v4379_v4 = vld [vmem:[%s4683_s21 + $0x80] ss:$20 sps:$4 sm:$0xff]  }
  0x8d   : > { %1492 = vmatpush1.bf16.msra.mxu0 %v4308_v5  ;;  %1574 = vmatpush1.bf16.msra.mxu1 %v4311_v6  ;;  %v4384_v5 = vld [vmem:[%s4683_s21 + $0xa4] ss:$20 sps:$4 sm:$0xff]   ;;  %v4387_v6 = vld [vmem:[%s4683_s21 + $0xac] ss:$20 sps:$4 sm:$0xff]  }
  0x8e   : > { %1493 = vmatprep.subr.bf16.mxu0 %v4316_v7  ;;  %1575 = vmatprep.subr.bf16.mxu1 %v4319_v8  ;;  %v4382_v7 = vld [vmem:[%s4683_s21 + $0xa0] ss:$20 sps:$4 sm:$0xff]   ;;  %v4385_v8 = vld [vmem:[%s4683_s21 + $0xa8] ss:$20 sps:$4 sm:$0xff]  }
  0x91   : > { %1494 = vmatpush1.bf16.msra.mxu0 %v4314_v9  ;;  %1576 = vmatpush1.bf16.msra.mxu1 %v4317_v10  ;;  %v4390_v9 = vld [vmem:[%s4683_s21 + $0xcc] ss:$20 sps:$4 sm:$0xff]   ;;  %v4393_v10 = vld [vmem:[%s4683_s21 + $0xd4] ss:$20 sps:$4 sm:$0xff]  }
  0x92   : > { %1495 = vmatprep.subr.bf16.mxu0 %v4322_v11  ;;  %1577 = vmatprep.subr.bf16.mxu1 %v4325_v12  ;;  %v4388_v11 = vld [vmem:[%s4683_s21 + $0xc8] ss:$20 sps:$4 sm:$0xff]   ;;  %v4391_v12 = vld [vmem:[%s4683_s21 + $0xd0] ss:$20 sps:$4 sm:$0xff]  }
  0x95   : > { %1496 = vmatpush1.bf16.msra.mxu0 %v4320_v14  ;;  %1578 = vmatpush1.bf16.msra.mxu1 %v4323_v15  ;;  %v4396_v14 = vld [vmem:[%s4683_s21 + $0xf4] ss:$20 sps:$4 sm:$0xff]   ;;  %v4399_v15 = vld [vmem:[%s4683_s21 + $0xfc] ss:$20 sps:$4 sm:$0xff]  }
  0x96   : > { %3935 = vmatprep.subr.bf16.mxu0 %v4326_v16  ;;  %3957 = vmatprep.subr.bf16.mxu1 %v4327_v18  ;;  %v4394_v16 = vld [vmem:[%s4683_s21 + $0xf0] ss:$20 sps:$4 sm:$0xff]   ;;  %v4397_v18 = vld [vmem:[%s4683_s21 + $0xf8] ss:$20 sps:$4 sm:$0xff]  }
  0x98   : > { %1498 = vmatmul.mubr.bf16.vlgmr.msra.gmra.mrb[0].mxu0 %v4844_v19  ;;  %1580 = vmatmul.mubr.bf16.vlgmr.msra.gmra.mrb[0].mxu1 %v4844_v19 }
  0x99   : > { %3936 = vmatpush3.bf16.msra.mxu0 %v4328_v20  ;;  %3958 = vmatpush3.bf16.msra.mxu1 %v4329_v21  ;;  %v4405_v20 = vld [vmem:[%s4683_s21 + $0x124] ss:$20 sps:$4 sm:$0xff]  }
  0x9a   : > { %3937 = vmatprep.subr.bf16.mxu0 %v4330_v22  ;;  %3959 = vmatprep.subr.bf16.mxu1 %v4331_v23  ;;  %v4400_v21 = vld [vmem:[%s4683_s21 + $0x118] ss:$20 sps:$4 sm:$0xff]   ;;  %v4403_v22 = vld [vmem:[%s4683_s21 + $0x120] ss:$20 sps:$4 sm:$0xff]  }
  0x9b   : > { %1620 = vmatprep.mubr.bf16.mxu0 %v4747_v59  ;;  %1660 = vmatprep.mubr.bf16.mxu1 %v4776_v17  ;;  %v4341_v59 = vld [vmem:[%s4678_s18 + $0x308] ss:$20 sps:$4 sm:$0xff]   ;;  %v4342_v17 = vld [vmem:[%s4678_s18 + $0x1f0] ss:$20 sps:$4 sm:$0xff]  }
  0x9c   : > { %v4408_v23 = vld [vmem:[%s4683_s21 + $0x144] ss:$20 sps:$4 sm:$0xff]  }
  0x9d   : > { %3938 = vmatpush3.bf16.msra.mxu0 %v4332_v24  ;;  %3960 = vmatpush3.bf16.msra.mxu1 %v4333_v25  ;;  %v4411_v24 = vld [vmem:[%s4683_s21 + $0x14c] ss:$20 sps:$4 sm:$0xff]  }
  0x9e   : > { %3939 = vmatprep.subr.bf16.mxu0 %v4334_v26  ;;  %3961 = vmatprep.subr.bf16.mxu1 %v4335_v27  ;;  %v4406_v25 = vld [vmem:[%s4683_s21 + $0x140] ss:$20 sps:$4 sm:$0xff]   ;;  %v4409_v26 = vld [vmem:[%s4683_s21 + $0x148] ss:$20 sps:$4 sm:$0xff]  }
  0x9f   : > { %v4414_v27 = vld [vmem:[%s4683_s21 + $0x16c] ss:$20 sps:$4 sm:$0xff]  }
  0xa1   : > { %3940 = vmatpush3.bf16.msra.mxu0 %v4336_v28  ;;  %3962 = vmatpush3.bf16.msra.mxu1 %v4337_v29  ;;  %v4417_v28 = vld [vmem:[%s4683_s21 + $0x174] ss:$20 sps:$4 sm:$0xff]  }
  0xa2   : > { %3941 = vmatprep.subr.bf16.mxu0 %v4338_v30  ;;  %3963 = vmatprep.subr.bf16.mxu1 %v4339_v31  ;;  %v4412_v29 = vld [vmem:[%s4683_s21 + $0x168] ss:$20 sps:$4 sm:$0xff]   ;;  %v4415_v30 = vld [vmem:[%s4683_s21 + $0x170] ss:$20 sps:$4 sm:$0xff]  }
  0xa3   : > { %v4420_v31 = vld [vmem:[%s4683_s21 + $0x194] ss:$20 sps:$4 sm:$0xff]  }
  0xa5   : > { %3942 = vmatpush3.bf16.msra.mxu0 %v4340_v32  ;;  %3964 = vmatpush3.bf16.msra.mxu1 %v4341_v59  ;;  %v4423_v32 = vld [vmem:[%s4683_s21 + $0x19c] ss:$20 sps:$4 sm:$0xff]  }
  0xa6   : > { %3943 = vmatprep.subr.bf16.mxu0 %v4342_v17  ;;  %3965 = vmatprep.subr.bf16.mxu1 %v4343_v33  ;;  %v4418_v59 = vld [vmem:[%s4683_s21 + $0x190] ss:$20 sps:$4 sm:$0xff]   ;;  %v4421_v17 = vld [vmem:[%s4683_s21 + $0x198] ss:$20 sps:$4 sm:$0xff]  }
  0xa7   : > { %v4426_v33 = vld [vmem:[%s4683_s21 + $0x1bc] ss:$20 sps:$4 sm:$0xff]  }
  0xa9   : > { %3944 = vmatpush3.bf16.msra.mxu0 %v4344_v34  ;;  %3966 = vmatpush3.bf16.msra.mxu1 %v4345_v35  ;;  %v4429_v34 = vld [vmem:[%s4683_s21 + $0x1c4] ss:$20 sps:$4 sm:$0xff]  }
  0xaa   : > { %3945 = vmatprep.subr.bf16.mxu0 %v4346_v36  ;;  %3967 = vmatprep.subr.bf16.mxu1 %v4347_v37  ;;  %v4424_v35 = vld [vmem:[%s4683_s21 + $0x1b8] ss:$20 sps:$4 sm:$0xff]   ;;  %v4427_v36 = vld [vmem:[%s4683_s21 + $0x1c0] ss:$20 sps:$4 sm:$0xff]  }
  0xab   : > { %v4432_v37 = vld [vmem:[%s4683_s21 + $0x1e4] ss:$20 sps:$4 sm:$0xff]  }
  0xad   : > { %3946 = vmatpush3.bf16.msra.mxu0 %v4348_v38  ;;  %3968 = vmatpush3.bf16.msra.mxu1 %v4349_v39  ;;  %v4435_v38 = vld [vmem:[%s4683_s21 + $0x1ec] ss:$20 sps:$4 sm:$0xff]  }
  0xae   : > { %3947 = vmatprep.subr.bf16.mxu0 %v4350_v40  ;;  %3969 = vmatprep.subr.bf16.mxu1 %v4351_v41  ;;  %v4430_v39 = vld [vmem:[%s4683_s21 + $0x1e0] ss:$20 sps:$4 sm:$0xff]   ;;  %v4433_v40 = vld [vmem:[%s4683_s21 + $0x1e8] ss:$20 sps:$4 sm:$0xff]  }
  0xaf   : > { %v4438_v41 = vld [vmem:[%s4683_s21 + $0x20c] ss:$20 sps:$4 sm:$0xff]  }
  0xb1   : > { %3948 = vmatpush3.bf16.msra.mxu0 %v4352_v42  ;;  %3970 = vmatpush3.bf16.msra.mxu1 %v4353_v43  ;;  %v4441_v42 = vld [vmem:[%s4683_s21 + $0x214] ss:$20 sps:$4 sm:$0xff]  }
  0xb2   : > { %3949 = vmatprep.subr.bf16.mxu0 %v4354_v44  ;;  %3971 = vmatprep.subr.bf16.mxu1 %v4355_v45  ;;  %v4436_v43 = vld [vmem:[%s4683_s21 + $0x208] ss:$20 sps:$4 sm:$0xff]   ;;  %v4439_v44 = vld [vmem:[%s4683_s21 + $0x210] ss:$20 sps:$4 sm:$0xff]  }
  0xb3   : > { %v4444_v45 = vld [vmem:[%s4683_s21 + $0x234] ss:$20 sps:$4 sm:$0xff]  }
  0xb5   : > { %3950 = vmatpush3.bf16.msra.mxu0 %v4356_v46  ;;  %3972 = vmatpush3.bf16.msra.mxu1 %v4357_v48  ;;  %v4447_v46 = vld [vmem:[%s4683_s21 + $0x23c] ss:$20 sps:$4 sm:$0xff]  }
  0xb6   : > { %2759 = vmatprep.subr.bf16.mxu0 %v4360_v49  ;;  %2841 = vmatprep.subr.bf16.mxu1 %v4363_v50  ;;  %v4442_v48 = vld [vmem:[%s4683_s21 + $0x230] ss:$20 sps:$4 sm:$0xff]   ;;  %v4445_v49 = vld [vmem:[%s4683_s21 + $0x238] ss:$20 sps:$4 sm:$0xff]  }
  0xb7   : > { %v4450_v50 = vld [vmem:[%s4683_s21 + $0x25c] ss:$20 sps:$4 sm:$0xff]  }
  0xb8   : > { %1621 = vmatmul.mubr.bf16.vlgmr.msra.gmra.mrb[4].mxu0 %v4769_v13  ;;  %1661 = vmatmul.mubr.bf16.vlgmr.msra.gmra.mrb[4].mxu1 %v4844_v19  ;;  %v4370_v13 = vld [vmem:[%s4683_s21 + $0x50] ss:$20 sps:$4 sm:$0xff]  }
  0xb9   : > { %2760 = vmatpush1.bf16.msra.mxu0 %v4358_v51  ;;  %2842 = vmatpush1.bf16.msra.mxu1 %v4361_v53  ;;  %v4402_v19 = vld [vmem:[%s4683_s21 + $0x11c] ss:$20 sps:$4 sm:$0xff]   ;;  %v4453_v51 = vld [vmem:[%s4683_s21 + $0x264] ss:$20 sps:$4 sm:$0xff]  }
  0xba   : > { %2761 = vmatprep.subr.bf16.mxu0 %v4366_v54  ;;  %2843 = vmatprep.subr.bf16.mxu1 %v4369_v56  ;;  %v4448_v53 = vld [vmem:[%s4683_s21 + $0x258] ss:$20 sps:$4 sm:$0xff]   ;;  %v4451_v54 = vld [vmem:[%s4683_s21 + $0x260] ss:$20 sps:$4 sm:$0xff]  }
  0xbb   : > { %2791 = vmatprep.mubr.bf16.mxu0 %v4899_v60  ;;  %2873 = vmatprep.mubr.bf16.mxu1 %v4899_v60  ;;  %v4456_v56 = vld [vmem:[%s4683_s21 + $0x284] ss:$20 sps:$4 sm:$0xff]  }
  0xbd   : > { %2762 = vmatpush1.bf16.msra.mxu0 %v4364_v58  ;;  %2844 = vmatpush1.bf16.msra.mxu1 %v4367_v61  ;;  %v4454_v58 = vld [vmem:[%s4683_s21 + $0x280] ss:$20 sps:$4 sm:$0xff]   ;;  %v4457_v61 = vld [vmem:[%s4683_s21 + $0x288] ss:$20 sps:$4 sm:$0xff]  }
  0xbe   : > { %2763 = vmatprep.subr.bf16.mxu0 %v4372_v62  ;;  %2845 = vmatprep.subr.bf16.mxu1 %v4375_v63  ;;  %v4966_v62 = vrot.slane %v4890_v55, %v4735_v52  ;;  %v4462_v63 = vld [vmem:[%s4683_s21 + $0x2ac] ss:$20 sps:$4 sm:$0xff]   ;;  %v4463_v52 = vld [vmem:[%s4683_s21 + $0x2b0] ss:$20 sps:$4 sm:$0xff]   ;;  %v4468_v55 = vld [vmem:[%s4683_s21 + $0x2d4] ss:$20 sps:$4 sm:$0xff]  }
  0xc1   : > { %2764 = vmatpush1.bf16.msra.mxu0 %v4370_v13  ;;  %2846 = vmatpush1.bf16.msra.mxu1 %v4373_v0  ;;  %v4465_v13 = vld [vmem:[%s4683_s21 + $0x2b4] ss:$20 sps:$4 sm:$0xff]  }
  0xc2   : > { %2765 = vmatprep.subr.bf16.mxu0 %v4378_v1  ;;  %2847 = vmatprep.subr.bf16.mxu1 %v4381_v2  ;;  %v4460_v0 = vld [vmem:[%s4683_s21 + $0x2a8] ss:$20 sps:$4 sm:$0xff]   ;;  %v4973_v1 = vcombine.high %v4899_v60, %v4899_v60 }
  0xc3   : > { %v4471_v2 = vld [vmem:[%s4683_s21 + $0x2dc] ss:$20 sps:$4 sm:$0xff]  }
  0xc5   : > { %2766 = vmatpush1.bf16.msra.mxu0 %v4376_v3  ;;  %2848 = vmatpush1.bf16.msra.mxu1 %v4379_v4  ;;  %v4466_v3 = vld [vmem:[%s4683_s21 + $0x2d0] ss:$20 sps:$4 sm:$0xff]   ;;  %v4469_v4 = vld [vmem:[%s4683_s21 + $0x2d8] ss:$20 sps:$4 sm:$0xff]  }
  0xc6   : > { %2767 = vmatprep.subr.bf16.mxu0 %v4384_v5  ;;  %2849 = vmatprep.subr.bf16.mxu1 %v4387_v6  ;;  %v4474_v5 = vld [vmem:[%s4683_s21 + $0x2fc] ss:$20 sps:$4 sm:$0xff]   ;;  %v4477_v6 = vld [vmem:[%s4683_s21 + $0x304] ss:$20 sps:$4 sm:$0xff]  }
  0xc9   : > { %2768 = vmatpush1.bf16.msra.mxu0 %v4382_v7  ;;  %2850 = vmatpush1.bf16.msra.mxu1 %v4385_v8  ;;  %v4472_v7 = vld [vmem:[%s4683_s21 + $0x2f8] ss:$20 sps:$4 sm:$0xff]   ;;  %v4475_v8 = vld [vmem:[%s4683_s21 + $0x300] ss:$20 sps:$4 sm:$0xff]  }
  0xca   : > { %2769 = vmatprep.subr.bf16.mxu0 %v4390_v9  ;;  %2851 = vmatprep.subr.bf16.mxu1 %v4393_v10  ;;  %v4480_v9 = vld [vmem:[%s4683_s21 + $0x324] ss:$20 sps:$4 sm:$0xff]   ;;  %v4483_v10 = vld [vmem:[%s4683_s21 + $0x32c] ss:$20 sps:$4 sm:$0xff]  }
  0xcd   : > { %2770 = vmatpush1.bf16.msra.mxu0 %v4388_v11  ;;  %2852 = vmatpush1.bf16.msra.mxu1 %v4391_v12  ;;  %v4478_v11 = vld [vmem:[%s4683_s21 + $0x320] ss:$20 sps:$4 sm:$0xff]   ;;  %v4481_v12 = vld [vmem:[%s4683_s21 + $0x328] ss:$20 sps:$4 sm:$0xff]  }
  0xce   : > { %2771 = vmatprep.subr.bf16.mxu0 %v4396_v14  ;;  %2853 = vmatprep.subr.bf16.mxu1 %v4399_v15  ;;  %v4486_v14 = vld [vmem:[%s4683_s21 + $0x34c] ss:$20 sps:$4 sm:$0xff]   ;;  %v4489_v15 = vld [vmem:[%s4683_s21 + $0x354] ss:$20 sps:$4 sm:$0xff]  }
  0xd1   : > { %2772 = vmatpush1.bf16.msra.mxu0 %v4394_v16  ;;  %2854 = vmatpush1.bf16.msra.mxu1 %v4397_v18  ;;  %v4484_v16 = vld [vmem:[%s4683_s21 + $0x348] ss:$20 sps:$4 sm:$0xff]   ;;  %v4487_v18 = vld [vmem:[%s4683_s21 + $0x350] ss:$20 sps:$4 sm:$0xff]  }
  0xd2   : > { %2773 = vmatprep.subr.bf16.mxu0 %v4402_v19  ;;  %2855 = vmatprep.subr.bf16.mxu1 %v4405_v20  ;;  %v4492_v19 = vld [vmem:[%s4683_s21 + $0x374] ss:$20 sps:$4 sm:$0xff]   ;;  %v4495_v20 = vld [vmem:[%s4683_s21 + $0x37c] ss:$20 sps:$4 sm:$0xff]  }
  0xd5   : > { %2774 = vmatpush1.bf16.msra.mxu0 %v4400_v21  ;;  %2856 = vmatpush1.bf16.msra.mxu1 %v4403_v22  ;;  %v4490_v21 = vld [vmem:[%s4683_s21 + $0x370] ss:$20 sps:$4 sm:$0xff]   ;;  %v4493_v22 = vld [vmem:[%s4683_s21 + $0x378] ss:$20 sps:$4 sm:$0xff]  }
  0xd6   : > { %2775 = vmatprep.subr.bf16.mxu0 %v4408_v23  ;;  %2857 = vmatprep.subr.bf16.mxu1 %v4411_v24  ;;  %v4498_v23 = vld [vmem:[%s4683_s21 + $0x39c] ss:$20 sps:$4 sm:$0xff]   ;;  %v4501_v24 = vld [vmem:[%s4683_s21 + $0x3a4] ss:$20 sps:$4 sm:$0xff]  }
  0xd9   : > { %2776 = vmatpush1.bf16.msra.mxu0 %v4406_v25  ;;  %2858 = vmatpush1.bf16.msra.mxu1 %v4409_v26  ;;  %v4496_v25 = vld [vmem:[%s4683_s21 + $0x398] ss:$20 sps:$4 sm:$0xff]   ;;  %v4499_v26 = vld [vmem:[%s4683_s21 + $0x3a0] ss:$20 sps:$4 sm:$0xff]  }
  0xda   : > { %2777 = vmatprep.subr.bf16.mxu0 %v4414_v27  ;;  %2859 = vmatprep.subr.bf16.mxu1 %v4417_v28  ;;  %v4504_v27 = vld [vmem:[%s4683_s21 + $0x3c4] ss:$20 sps:$4 sm:$0xff]   ;;  %v4507_v28 = vld [vmem:[%s4683_s21 + $0x3cc] ss:$20 sps:$4 sm:$0xff]  }
  0xdd   : > { %2778 = vmatpush1.bf16.msra.mxu0 %v4412_v29  ;;  %2860 = vmatpush1.bf16.msra.mxu1 %v4415_v30  ;;  %v4502_v29 = vld [vmem:[%s4683_s21 + $0x3c0] ss:$20 sps:$4 sm:$0xff]   ;;  %v4505_v30 = vld [vmem:[%s4683_s21 + $0x3c8] ss:$20 sps:$4 sm:$0xff]  }
  0xde   : > { %2779 = vmatprep.subr.bf16.mxu0 %v4420_v31  ;;  %2861 = vmatprep.subr.bf16.mxu1 %v4423_v32  ;;  %v4510_v31 = vld [vmem:[%s4683_s21 + $0x3ec] ss:$20 sps:$4 sm:$0xff]   ;;  %v4513_v32 = vld [vmem:[%s4683_s21 + $0x3f4] ss:$20 sps:$4 sm:$0xff]  }
  0xe1   : > { %2780 = vmatpush1.bf16.msra.mxu0 %v4418_v59  ;;  %2862 = vmatpush1.bf16.msra.mxu1 %v4421_v17  ;;  %v4508_v59 = vld [vmem:[%s4683_s21 + $0x3e8] ss:$20 sps:$4 sm:$0xff]   ;;  %v4511_v17 = vld [vmem:[%s4683_s21 + $0x3f0] ss:$20 sps:$4 sm:$0xff]  }
  0xe2   : > { %2781 = vmatprep.subr.bf16.mxu0 %v4426_v33  ;;  %2863 = vmatprep.subr.bf16.mxu1 %v4429_v34  ;;  %v4516_v33 = vld [vmem:[%s4683_s21 + $0x414] ss:$20 sps:$4 sm:$0xff]   ;;  %v4519_v34 = vld [vmem:[%s4683_s21 + $0x41c] ss:$20 sps:$4 sm:$0xff]  }
  0xe5   : > { %2782 = vmatpush1.bf16.msra.mxu0 %v4424_v35  ;;  %2864 = vmatpush1.bf16.msra.mxu1 %v4427_v36  ;;  %v4514_v35 = vld [vmem:[%s4683_s21 + $0x410] ss:$20 sps:$4 sm:$0xff]   ;;  %v4517_v36 = vld [vmem:[%s4683_s21 + $0x418] ss:$20 sps:$4 sm:$0xff]  }
  0xe6   : > { %2783 = vmatprep.subr.bf16.mxu0 %v4432_v37  ;;  %2865 = vmatprep.subr.bf16.mxu1 %v4435_v38  ;;  %v4522_v37 = vld [vmem:[%s4683_s21 + $0x43c] ss:$20 sps:$4 sm:$0xff]   ;;  %v4525_v38 = vld [vmem:[%s4683_s21 + $0x444] ss:$20 sps:$4 sm:$0xff]  }
  0xe9   : > { %2784 = vmatpush1.bf16.msra.mxu0 %v4430_v39  ;;  %2866 = vmatpush1.bf16.msra.mxu1 %v4433_v40  ;;  %v4520_v39 = vld [vmem:[%s4683_s21 + $0x438] ss:$20 sps:$4 sm:$0xff]   ;;  %v4523_v40 = vld [vmem:[%s4683_s21 + $0x440] ss:$20 sps:$4 sm:$0xff]  }
  0xea   : > { %2785 = vmatprep.subr.bf16.mxu0 %v4438_v41  ;;  %2867 = vmatprep.subr.bf16.mxu1 %v4441_v42  ;;  %v4528_v41 = vld [vmem:[%s4683_s21 + $0x464] ss:$20 sps:$4 sm:$0xff]   ;;  %v4531_v42 = vld [vmem:[%s4683_s21 + $0x46c] ss:$20 sps:$4 sm:$0xff]  }
  0xed   : > { %2786 = vmatpush1.bf16.msra.mxu0 %v4436_v43  ;;  %2868 = vmatpush1.bf16.msra.mxu1 %v4439_v44  ;;  %v4526_v43 = vld [vmem:[%s4683_s21 + $0x460] ss:$20 sps:$4 sm:$0xff]   ;;  %v4529_v44 = vld [vmem:[%s4683_s21 + $0x468] ss:$20 sps:$4 sm:$0xff]  }
  0xee   : > { %2787 = vmatprep.subr.bf16.mxu0 %v4444_v45  ;;  %2869 = vmatprep.subr.bf16.mxu1 %v4447_v46  ;;  %v4534_v45 = vld [vmem:[%s4683_s21 + $0x48c] ss:$20 sps:$4 sm:$0xff]   ;;  %v4537_v46 = vld [vmem:[%s4683_s21 + $0x494] ss:$20 sps:$4 sm:$0xff]  }
  0xf1   : > { %2788 = vmatpush1.bf16.msra.mxu0 %v4442_v48  ;;  %2870 = vmatpush1.bf16.msra.mxu1 %v4445_v49  ;;  %v4532_v48 = vld [vmem:[%s4683_s21 + $0x488] ss:$20 sps:$4 sm:$0xff]   ;;  %v4535_v49 = vld [vmem:[%s4683_s21 + $0x490] ss:$20 sps:$4 sm:$0xff]  }
  0xf2   : > { %2789 = vmatprep.subr.bf16.mxu0 %v4450_v50  ;;  %2871 = vmatprep.subr.bf16.mxu1 %v4453_v51  ;;  %v4540_v50 = vld [vmem:[%s4683_s21 + $0x4b4] ss:$20 sps:$4 sm:$0xff]   ;;  %v4543_v51 = vld [vmem:[%s4683_s21 + $0x4bc] ss:$20 sps:$4 sm:$0xff]  }
  0xf5   : > { %2790 = vmatpush1.bf16.msra.mxu0 %v4448_v53  ;;  %2872 = vmatpush1.bf16.msra.mxu1 %v4451_v54  ;;  %v4538_v53 = vld [vmem:[%s4683_s21 + $0x4b0] ss:$20 sps:$4 sm:$0xff]   ;;  %v4541_v54 = vld [vmem:[%s4683_s21 + $0x4b8] ss:$20 sps:$4 sm:$0xff]  }
  0xf6   : > { %2800 = vmatprep.subr.bf16.mxu0 %v4456_v56  ;;  %2882 = vmatprep.subr.bf16.mxu1 %v4459_v57  ;;  %v4546_v56 = vld [vmem:[%s4683_s21 + $0x4dc] ss:$20 sps:$4 sm:$0xff]   ;;  %v4549_v57 = vld [vmem:[%s4683_s21 + $0x4e4] ss:$20 sps:$4 sm:$0xff]  }
  0xf8   : > { %2792 = vmatmul.mubr.bf16.vlgmr.msra.gmra.mrb[8].mxu0 %v4966_v62  ;;  %2874 = vmatmul.mubr.bf16.vlgmr.msra.gmra.mrb[8].mxu1 %v4966_v62 }
  0xf9   : > { %2801 = vmatpush1.bf16.msra.mxu0 %v4454_v58  ;;  %2883 = vmatpush1.bf16.msra.mxu1 %v4457_v61  ;;  %v4544_v58 = vld [vmem:[%s4683_s21 + $0x4d8] ss:$20 sps:$4 sm:$0xff]   ;;  %v4547_v61 = vld [vmem:[%s4683_s21 + $0x4e0] ss:$20 sps:$4 sm:$0xff]  }
  0xfa   : > { %2802 = vmatprep.subr.bf16.mxu0 %v4462_v63  ;;  %2884 = vmatprep.subr.bf16.mxu1 %v4465_v13  ;;  %v4550_v63 = vld [vmem:[%s4683_s21 + $0x150] ss:$20 sps:$4 sm:$0xff]  }
  0xfb   : > { %2832 = vmatprep.mubr.bf16.mxu0 %v4973_v1  ;;  %2914 = vmatprep.mubr.bf16.mxu1 %v4973_v1  ;;  %v4551_v13 = vld [vmem:[%s4683_s21 + $0x3d0] ss:$20 sps:$4 sm:$0xff]  }
  0xfd   : > { %2803 = vmatpush1.bf16.msra.mxu0 %v4460_v0  ;;  %2885 = vmatpush1.bf16.msra.mxu1 %v4463_v52  ;;  %v5040_v0 = vcombine.high %v4966_v62, %v4966_v62  ;;  %v4552_v52 = vld [vmem:[%s4683_s21 + $0x10] ss:$20 sps:$4 sm:$0xff]  }
  0xfe   : > { %2804 = vmatprep.subr.bf16.mxu0 %v4468_v55  ;;  %2886 = vmatprep.subr.bf16.mxu1 %v4471_v2  ;;  %v4553_v55 = vld [vmem:[%s4683_s21 + $0x290] ss:$20 sps:$4 sm:$0xff]   ;;  %v4554_v2 = vld [vmem:[%s4683_s21 + $0x178] ss:$20 sps:$4 sm:$0xff]  }
 0x101   : > { %2805 = vmatpush1.bf16.msra.mxu0 %v4466_v3  ;;  %2887 = vmatpush1.bf16.msra.mxu1 %v4469_v4  ;;  %v4555_v3 = vld [vmem:[%s4683_s21 + $0x3f8] ss:$20 sps:$4 sm:$0xff]  }
 0x102   : > { %2806 = vmatprep.subr.bf16.mxu0 %v4474_v5  ;;  %2888 = vmatprep.subr.bf16.mxu1 %v4477_v6  ;;  %v4556_v4 = vld [vmem:[%s4683_s21 + $0x38] ss:$20 sps:$4 sm:$0xff]   ;;  %v4558_v6 = vld [vmem:[%s4683_s21 + $0x1a0] ss:$20 sps:$4 sm:$0xff]  }
 0x103   : > { %v4557_v5 = vld [vmem:[%s4683_s21 + $0x2b8] ss:$20 sps:$4 sm:$0xff]  }
 0x105   : > { %2807 = vmatpush1.bf16.msra.mxu0 %v4472_v7  ;;  %2889 = vmatpush1.bf16.msra.mxu1 %v4475_v8  ;;  %v4559_v7 = vld [vmem:[%s4683_s21 + $0x420] ss:$20 sps:$4 sm:$0xff]  }
 0x106   : > { %2808 = vmatprep.subr.bf16.mxu0 %v4480_v9  ;;  %2890 = vmatprep.subr.bf16.mxu1 %v4483_v10  ;;  %v4560_v8 = vld [vmem:[%s4683_s21 + $0x60] ss:$20 sps:$4 sm:$0xff]   ;;  %v4562_v10 = vld [vmem:[%s4683_s21 + $0x1c8] ss:$20 sps:$4 sm:$0xff]  }
 0x107   : > { %v4561_v9 = vld [vmem:[%s4683_s21 + $0x2e0] ss:$20 sps:$4 sm:$0xff]  }
 0x109   : > { %2809 = vmatpush1.bf16.msra.mxu0 %v4478_v11  ;;  %2891 = vmatpush1.bf16.msra.mxu1 %v4481_v12  ;;  %v4563_v11 = vld [vmem:[%s4683_s21 + $0x448] ss:$20 sps:$4 sm:$0xff]  }
 0x10a   : > { %2810 = vmatprep.subr.bf16.mxu0 %v4486_v14  ;;  %2892 = vmatprep.subr.bf16.mxu1 %v4489_v15  ;;  %v4564_v12 = vld [vmem:[%s4683_s21 + $0x88] ss:$20 sps:$4 sm:$0xff]   ;;  %v4567_v14 = vld [vmem:[%s4683_s21 + $0x470] ss:$20 sps:$4 sm:$0xff]  }
 0x10b   : > { %v4568_v15 = vld [vmem:[%s4683_s21 + $0xb0] ss:$20 sps:$4 sm:$0xff]  }
 0x10d   : > { %2811 = vmatpush1.bf16.msra.mxu0 %v4484_v16  ;;  %2893 = vmatpush1.bf16.msra.mxu1 %v4487_v18  ;;  %v4569_v16 = vld [vmem:[%s4683_s21 + $0x330] ss:$20 sps:$4 sm:$0xff]   ;;  %v4570_v18 = vld [vmem:[%s4683_s21 + $0x218] ss:$20 sps:$4 sm:$0xff]  }
 0x10e   : > { %2812 = vmatprep.subr.bf16.mxu0 %v4492_v19  ;;  %2894 = vmatprep.subr.bf16.mxu1 %v4495_v20  ;;  %v4571_v19 = vld [vmem:[%s4683_s21 + $0x498] ss:$20 sps:$4 sm:$0xff]  }
 0x10f   : > { %v4572_v20 = vld [vmem:[%s4683_s21 + $0xd8] ss:$20 sps:$4 sm:$0xff]  }
 0x111   : > { %2813 = vmatpush1.bf16.msra.mxu0 %v4490_v21  ;;  %2895 = vmatpush1.bf16.msra.mxu1 %v4493_v22  ;;  %v4573_v21 = vld [vmem:[%s4683_s21 + $0x358] ss:$20 sps:$4 sm:$0xff]   ;;  %v4574_v22 = vld [vmem:[%s4683_s21 + $0x240] ss:$20 sps:$4 sm:$0xff]  }
 0x112   : > { %2814 = vmatprep.subr.bf16.mxu0 %v4498_v23  ;;  %2896 = vmatprep.subr.bf16.mxu1 %v4501_v24  ;;  %v4575_v23 = vld [vmem:[%s4683_s21 + $0x4c0] ss:$20 sps:$4 sm:$0xff]  }
 0x113   : > { %v4576_v24 = vld [vmem:[%s4683_s21 + $0x100] ss:$20 sps:$4 sm:$0xff]  }
 0x115   : > { %2815 = vmatpush1.bf16.msra.mxu0 %v4496_v25  ;;  %2897 = vmatpush1.bf16.msra.mxu1 %v4499_v26  ;;  %v4577_v25 = vld [vmem:[%s4683_s21 + $0x380] ss:$20 sps:$4 sm:$0xff]   ;;  %v4578_v26 = vld [vmem:[%s4683_s21 + $0x268] ss:$20 sps:$4 sm:$0xff]  }
 0x116   : > { %2816 = vmatprep.subr.bf16.mxu0 %v4504_v27  ;;  %2898 = vmatprep.subr.bf16.mxu1 %v4507_v28  ;;  %v4579_v27 = vld [vmem:[%s4683_s21 + $0x4e8] ss:$20 sps:$4 sm:$0xff]  }
 0x117   : > { %v4580_v28 = vld [vmem:[%s4683_s21 + $0x128] ss:$20 sps:$4 sm:$0xff]  }
 0x119   : > { %2817 = vmatpush1.bf16.msra.mxu0 %v4502_v29  ;;  %2899 = vmatpush1.bf16.msra.mxu1 %v4505_v30  ;;  %v4581_v29 = vld [vmem:[%s4683_s21 + $0x3a8] ss:$20 sps:$4 sm:$0xff]   ;;  %v4600_v30 = vmov 1983009808  }
 0x11a   : > { %2818 = vmatprep.subr.bf16.mxu0 %v4510_v31  ;;  %2900 = vmatprep.subr.bf16.mxu1 %v4513_v32  ;;  %v1676_v31 = vunpack.c.l.s4 %v4600_v30  ;;  %v3052_v30 = vsub.s32 (!%p3931_p6), 1, %v4728_v47 }
 0x11c   : > { %v1677_v32 = vunpack.c.0.s8 %v1676_v31  ;;  %v3056_v31 = vsub.s32 (!%p3931_p6), 2, %v4728_v47 }
 0x11d   : > { %2819 = vmatpush1.bf16.msra.mxu0 %v4508_v59  ;;  %2901 = vmatpush1.bf16.msra.mxu1 %v4511_v17 }
 0x11e   : > { %2820 = vmatprep.subr.bf16.mxu0 %v4516_v33  ;;  %2902 = vmatprep.subr.bf16.mxu1 %v4519_v34  ;;  %v5079_v59 = vsub.s32 %v1677_v32, %v4728_v47  ;;  %v3060_v32 = vsub.s32 (!%p3931_p6), 3, %v4728_v47 }
 0x121   : > { %2821 = vmatpush1.bf16.msra.mxu0 %v4514_v35  ;;  %2903 = vmatpush1.bf16.msra.mxu1 %v4517_v36 }
 0x122   : > { %2822 = vmatprep.subr.bf16.mxu0 %v4522_v37  ;;  %2904 = vmatprep.subr.bf16.mxu1 %v4525_v38 }
 0x125   : > { %2823 = vmatpush1.bf16.msra.mxu0 %v4520_v39  ;;  %2905 = vmatpush1.bf16.msra.mxu1 %v4523_v40 }
 0x126   : > { %2824 = vmatprep.subr.bf16.mxu0 %v4528_v41  ;;  %2906 = vmatprep.subr.bf16.mxu1 %v4531_v42 }
 0x129   : > { %2825 = vmatpush1.bf16.msra.mxu0 %v4526_v43  ;;  %2907 = vmatpush1.bf16.msra.mxu1 %v4529_v44  ;;  %v368_v43 = vld [vmem:[#allocation2] sm:$0xff] }
 0x12a   : > { %2826 = vmatprep.subr.bf16.mxu0 %v4534_v45  ;;  %2908 = vmatprep.subr.bf16.mxu1 %v4537_v46 }
 0x12d   : > { %2827 = vmatpush1.bf16.msra.mxu0 %v4532_v48  ;;  %2909 = vmatpush1.bf16.msra.mxu1 %v4535_v49 }
 0x12e   : > { %2828 = vmatprep.subr.bf16.mxu0 %v4540_v50  ;;  %2910 = vmatprep.subr.bf16.mxu1 %v4543_v51 }
 0x131   : > { %2829 = vmatpush1.bf16.msra.mxu0 %v4538_v53  ;;  %2911 = vmatpush1.bf16.msra.mxu1 %v4541_v54 }
 0x132   : > { %2830 = vmatprep.subr.bf16.mxu0 %v4546_v56  ;;  %2912 = vmatprep.subr.bf16.mxu1 %v4549_v57 }
 0x135   : > { %2831 = vmatpush1.bf16.msra.mxu0 %v4544_v58  ;;  %2913 = vmatpush1.bf16.msra.mxu1 %v4547_v61 }
 0x136   : > { %3979 = vmatprep.subr.bf16.mxu0 %v4550_v63  ;;  %4001 = vmatprep.subr.bf16.mxu1 %v4551_v13  ;;  %v369_v63 = vld [vmem:[#allocation2 + $0x8] sm:$0x3] }
 0x138   : > { %2833 = vmatmul.mubr.bf16.vlgmr.msra.gmra.mrb[8].mxu0 %v5040_v0  ;;  %2915 = vmatmul.mubr.bf16.vlgmr.msra.gmra.mrb[8].mxu1 %v5040_v0 }
 0x139   : > { %3980 = vmatpush3.bf16.msra.mxu0 %v4552_v52  ;;  %4002 = vmatpush3.bf16.msra.mxu1 %v4553_v55 }
 0x13a   : > { %3981 = vmatprep.subr.bf16.mxu0 %v4554_v2  ;;  %4003 = vmatprep.subr.bf16.mxu1 %v4555_v3 }
 0x13b   : > { %2955 = vmatprep.mubr.bf16.mxu0 %v4899_v60  ;;  %2995 = vmatprep.mubr.bf16.mxu1 %v4973_v1  ;;  %v4565_v60 = vld [vmem:[%s4683_s21 + $0x308] ss:$20 sps:$4 sm:$0xff]   ;;  %v4566_v1 = vld [vmem:[%s4683_s21 + $0x1f0] ss:$20 sps:$4 sm:$0xff]  }
 0x13d   : > { %3982 = vmatpush3.bf16.msra.mxu0 %v4556_v4  ;;  %4004 = vmatpush3.bf16.msra.mxu1 %v4557_v5 }
 0x13e   : > { %3983 = vmatprep.subr.bf16.mxu0 %v4558_v6  ;;  %4005 = vmatprep.subr.bf16.mxu1 %v4559_v7 }
 0x141   : > { %3984 = vmatpush3.bf16.msra.mxu0 %v4560_v8  ;;  %4006 = vmatpush3.bf16.msra.mxu1 %v4561_v9 }
 0x142   : > { %3985 = vmatprep.subr.bf16.mxu0 %v4562_v10  ;;  %4007 = vmatprep.subr.bf16.mxu1 %v4563_v11 }
 0x145   : > { %3986 = vmatpush3.bf16.msra.mxu0 %v4564_v12  ;;  %4008 = vmatpush3.bf16.msra.mxu1 %v4565_v60  ;;  %v1703_v12 = vld [vmem:[#allocation3] sm:$0xff] }
 0x146   : > { %3987 = vmatprep.subr.bf16.mxu0 %v4566_v1  ;;  %4009 = vmatprep.subr.bf16.mxu1 %v4567_v14 }
 0x149   : > { %3988 = vmatpush3.bf16.msra.mxu0 %v4568_v15  ;;  %4010 = vmatpush3.bf16.msra.mxu1 %v4569_v16 }
 0x14a   : > { %3989 = vmatprep.subr.bf16.mxu0 %v4570_v18  ;;  %4011 = vmatprep.subr.bf16.mxu1 %v4571_v19 }
 0x14d   : > { %3990 = vmatpush3.bf16.msra.mxu0 %v4572_v20  ;;  %4012 = vmatpush3.bf16.msra.mxu1 %v4573_v21 }
 0x14e   : > { %3991 = vmatprep.subr.bf16.mxu0 %v4574_v22  ;;  %4013 = vmatprep.subr.bf16.mxu1 %v4575_v23 }
 0x151   : > { %3992 = vmatpush3.bf16.msra.mxu0 %v4576_v24  ;;  %4014 = vmatpush3.bf16.msra.mxu1 %v4577_v25 }
 0x152   : > { %3993 = vmatprep.subr.bf16.mxu0 %v4578_v26  ;;  %4015 = vmatprep.subr.bf16.mxu1 %v4579_v27  ;;  %v1704_v26 = vld [vmem:[#allocation3 + $0x8] sm:$0x3] }
 0x155   : > { %3994 = vmatpush3.bf16.msra.mxu0 %v4580_v28  ;;  %4016 = vmatpush3.bf16.msra.mxu1 %v4581_v29  ;;  %v3048_v29 = vsub.s32 (!%p3931_p6), 0, %v4728_v47 }
 0x158   : > { %2956 = vmatmul.mubr.bf16.vlgmr.msra.gmra.mrb[12].mxu0 %v4966_v62  ;;  %2996 = vmatmul.mubr.bf16.vlgmr.msra.gmra.mrb[12].mxu1 %v5040_v0 }
 0x16b   : > { %v1499_v17 = vpop.f32.mrb[0].mxu0  ;;  %v1581_v33 = vpop.f32.mrb[0].mxu1 }
 0x16c   : > { %v1501_v34 = vpop.f32.mrb[1].mxu0  ;;  %v1583_v35 = vpop.f32.mrb[1].mxu1 }
 0x16d   : > { %v1673_v36 = vcombine.low %v1499_v17, %v1501_v34  ;;  %v1674_v37 = vcombine.low %v1581_v33, %v1583_v35  ;;  %v1503_v38 = vpop.f32.mrb[2].mxu0  ;;  %v1585_v39 = vpop.f32.mrb[2].mxu1  ;;  %v3096_v17 = vld [vmem:[%s5243_s5] sm:$0x1f] (!%p3931_p6) }
 0x16e   : > { %v1504_v40 = vpop.f32.mrb[3].mxu0  ;;  %v1586_v41 = vpop.f32.mrb[3].mxu1  ;;  %v3044_v33 = vld [vmem:[%s5242_s4] sm:$0x1f] (!%p3931_p6)  ;;  %v3101_v34 = vrot.slane (!%p3931_p6), %v3096_v17, %v3048_v29  ;;  %v3105_v35 = vrot.slane (!%p3931_p6), %v3096_v17, %v3052_v30 }
 0x16f   : > { %v1681_v62 = vrot.slane %v1673_v36, %v5079_v59  ;;  %v1688_v42 = vrot.slane %v1674_v37, %v5079_v59  ;;  %v3109_v36 = vrot.slane (!%p3931_p6), %v3096_v17, %v3056_v31  ;;  %v3113_v37 = vrot.slane (!%p3931_p6), %v3096_v17, %v3060_v32 }
 0x170   : > { %v3049_v38 = vrot.slane (!%p3931_p6), %v3044_v33, %v3048_v29  ;;  %v3053_v39 = vrot.slane (!%p3931_p6), %v3044_v33, %v3052_v30  ;;  %v3057_v40 = vrot.slane (!%p3931_p6), %v3044_v33, %v3056_v31  ;;  %v3061_v41 = vrot.slane (!%p3931_p6), %v3044_v33, %v3060_v32  ;;  %v3405_v29 = vld [vmem:[%s5244_s6 + $0x40] sm:$0xff] (!%p3931_p6)  ;;  %v3406_v30 = vld [vmem:[%s5244_s6 + $0x48] sm:$0xff] (!%p3931_p6)  ;;  %v3407_v32 = vld [vmem:[%s5244_s6 + $0x50] sm:$0xff] (!%p3931_p6) }
 0x171   : > { %v1689_v44 = vcombine.low %v1681_v62, %v1688_v42  ;;  %v3118_v62 = vcombine.low (!%p3931_p6), %v3101_v34, %v3105_v35  ;;  %v3119_v42 = vcombine.low (!%p3931_p6), %v3109_v36, %v3113_v37  ;;  %v4088_v31 = vpack.c.bf16 (!%p3931_p6), %v3406_v30, %v3405_v29  ;;  %v3409_v34 = vld [vmem:[%s5244_s6 + $0x60] sm:$0xff] (!%p3931_p6)  ;;  %v3410_v35 = vld [vmem:[%s5244_s6 + $0x68] sm:$0xff] (!%p3931_p6)  ;;  %v3411_v37 = vld [vmem:[%s5244_s6 + $0x70] sm:$0xff] (!%p3931_p6) }
 0x172   : > { %v4094_v36 = vpack.c.bf16 (!%p3931_p6), %v3410_v35, %v3409_v34 }
 0x173   : > { %v1699_v45 = vadd.f32 %v1689_v44, %v368_v43  ;;  %v3066_v43 = vcombine.low (!%p3931_p6), %v3049_v38, %v3053_v39  ;;  %v3067_v44 = vcombine.low (!%p3931_p6), %v3057_v40, %v3061_v41  ;;  %v3412_v38 = vld [vmem:[%s5244_s6 + $0x78] sm:$0xff] (!%p3931_p6) }
 0x174   : > { %v4097_v39 = vpack.c.bf16 (!%p3931_p6), %v3412_v38, %v3411_v37 }
 0x175   : > { %1701 = vst [vmem:[#allocation2] sm:$0xff] %v1699_v45  ;;  %v3126_v45 = vrot.slane (!%p3931_p6), %v3118_v62, %v5079_v59 }
 0x18b   : > { %v3951_v46 = vpop.f32.mrb[4].mxu0  ;;  %v3973_v48 = vpop.f32.mrb[4].mxu1 }
 0x18c   : > { %v3952_v49 = vpop.f32.mrb[5].mxu0  ;;  %v3974_v50 = vpop.f32.mrb[5].mxu1 }
 0x18d   : > { %v3953_v51 = vadd.f32 %v3952_v49, %v3951_v46  ;;  %v3975_v53 = vadd.f32 %v3974_v50, %v3973_v48  ;;  %v3954_v54 = vpop.f32.mrb[6].mxu0  ;;  %v3976_v56 = vpop.f32.mrb[6].mxu1  ;;  %v3133_v46 = vrot.slane (!%p3931_p6), %v3119_v42, %v5079_v59  ;;  %v3074_v49 = vrot.slane (!%p3931_p6), %v3066_v43, %v5079_v59 }
 0x18e   : > { %v3955_v57 = vpop.f32.mrb[7].mxu0  ;;  %v3977_v58 = vpop.f32.mrb[7].mxu1  ;;  %v3081_v50 = vrot.slane (!%p3931_p6), %v3067_v44, %v5079_v59 }
 0x18f   : > { %v1663_v61 = vadd.f32 %v3975_v53, %v3953_v51  ;;  %v3134_v51 = vcombine.low (!%p3931_p6), %v3126_v45, %v3133_v46  ;;  %v3042_v53 = vld [vmem:[#allocation2] sm:$0xff] (!%p3931_p6) }
 0x190   : > { %v3082_v54 = vcombine.low (!%p3931_p6), %v3074_v49, %v3081_v50 }
 0x191   : > { %v1696_v13 = vrot.slane %v1663_v61, %v5079_v59 }
 0x192   : > { %v5104_v57 = vadd.f32 (!%p3931_p6), %v3082_v54, %v3042_v53 }
 0x193   : > { %v1700_v0 = vadd.f32 %v1696_v13, %v369_v63 }
 0x194   : > { %v3189_v61 = vmul.f32 (!%p3931_p6), %v5104_v57, %v5104_v57 }
 0x195   : > { %1702 = vst [vmem:[#allocation2 + $0x8] sm:$0x3] %v1700_v0 }
 0x196   : > { %v3198_v13 = vrot.slane (!%p3931_p6), %v3189_v61, %v5079_v59  ;;  %v3191_v0 = vcombine.high (!%p3931_p6), %v3189_v61, %v3189_v61 }
 0x198   : > { %3207 = vrot.lane.b32.xlu0 (!%p3931_p6), %v3198_v13, %s4601_s28 }
 0x20a   : > { %v3208_v41 = vpop.permute.xlu0 (!%p3931_p6), %3207 }
 0x20b   : > { %v2834_v52 = vpop.f32.mrb[8].mxu0  ;;  %v2916_v55 = vpop.f32.mrb[8].mxu1 }
 0x20c   : > { %v2836_v2 = vpop.f32.mrb[9].mxu0  ;;  %v2918_v3 = vpop.f32.mrb[9].mxu1 }
 0x20d   : > { %v3008_v4 = vcombine.low %v2834_v52, %v2836_v2  ;;  %v3009_v5 = vcombine.low %v2916_v55, %v2918_v3  ;;  %v2838_v6 = vpop.f32.mrb[10].mxu0  ;;  %v2920_v7 = vpop.f32.mrb[10].mxu1  ;;  %v3206_v55 = vcombine.high (!%p3931_p6), %v3198_v13, %v3198_v13  ;;  %v3205_v2 = vrot.slane (!%p3931_p6), %v3191_v0, %v5079_v59 }
 0x20e   : > { %v2839_v8 = vpop.f32.mrb[11].mxu0  ;;  %v2921_v9 = vpop.f32.mrb[11].mxu1  ;;  %v3064_v3 = vsub.s32 (!%p3931_p6), 4, %v4728_v47 }
 0x20f   : > { %v3016_v10 = vrot.slane %v3008_v4, %v5079_v59  ;;  %v3023_v11 = vrot.slane %v3009_v5, %v5079_v59  ;;  %3209 = vrot.lane.b32.xlu0 (!%p3931_p6), %v3206_v55, %s4601_s28 }
 0x210   : > { %v3065_v6 = vrot.slane (!%p3931_p6), %v3044_v33, %v3064_v3  ;;  %v3117_v9 = vrot.slane (!%p3931_p6), %v3096_v17, %v3064_v3  ;;  %v3408_v17 = vld [vmem:[%s5244_s6 + $0x58] sm:$0xff] (!%p3931_p6) }
 0x211   : > { %v3024_v60 = vcombine.low %v3016_v10, %v3023_v11  ;;  %v3043_v10 = vld [vmem:[#allocation2 + $0x8] sm:$0x3] (!%p3931_p6)  ;;  %v4091_v33 = vpack.c.bf16 (!%p3931_p6), %v3408_v17, %v3407_v32 }
 0x212   : > { %v3089_v8 = vrot.slane (!%p3931_p6), %v3065_v6, %v5079_v59 }
 0x213   : > { %v3034_v1 = vadd.f32 %v3024_v60, %v1703_v12  ;;  %v3141_v12 = vrot.slane (!%p3931_p6), %v3117_v9, %v5079_v59 }
 0x214   : > { %v3093_v11 = vadd.f32 (!%p3931_p6), %v3089_v8, %v3043_v10 }
 0x215   : > { %3036 = vst [vmem:[#allocation3] sm:$0xff] %v3034_v1 }
 0x21c   : > { %v3094_v48 = vld [vmem:[#allocation3] sm:$0xff] (!%p3931_p6) }
 0x21d   : > { %v5102_v56 = vadd.f32 (!%p3931_p6), %v3134_v51, %v3094_v48 }
 0x21f   : > { %v3275_v58 = vmul.f32 (!%p3931_p6), %v5102_v56, %v5102_v56  ;;  %v5123_v7 = vrot.slane (!%p3931_p6), %v5102_v56, %v5079_v59 }
 0x221   : > { %v3284_v63 = vrot.slane (!%p3931_p6), %v3275_v58, %v5079_v59  ;;  %v3277_v52 = vcombine.high (!%p3931_p6), %v3275_v58, %v3275_v58 }
 0x223   : > { %3293 = vrot.lane.b32.xlu1 (!%p3931_p6), %v3284_v63, %s4601_s28  ;;  %v3291_v4 = vrot.slane (!%p3931_p6), %v3277_v52, %v5079_v59  ;;  %v3292_v5 = vcombine.high (!%p3931_p6), %v3284_v63, %v3284_v63 }
 0x225   : > { %3295 = vrot.lane.b32.xlu0 (!%p3931_p6), %v3292_v5, %s4601_s28 }
 0x227   : > { %3211 = vrot.lane.b32.xlu1 (!%p3931_p6), %v3205_v2, %s4601_s28 }
 0x229   : > { %3393 = vrot.lane.b32.xlu0 (!%p3931_p6), %v5123_v7, %s4601_s28 }
 0x22b   : > { %v3995_v14 = vpop.f32.mrb[12].mxu0  ;;  %v4017_v15 = vpop.f32.mrb[12].mxu1  ;;  %3297 = vrot.lane.b32.xlu1 (!%p3931_p6), %v3291_v4, %s4601_s28 }
 0x22c   : > { %v3996_v16 = vpop.f32.mrb[13].mxu0  ;;  %v4018_v18 = vpop.f32.mrb[13].mxu1 }
 0x22d   : > { %v3997_v19 = vadd.f32 %v3996_v16, %v3995_v14  ;;  %v4019_v20 = vadd.f32 %v4018_v18, %v4017_v15  ;;  %v3998_v21 = vpop.f32.mrb[14].mxu0  ;;  %v4020_v22 = vpop.f32.mrb[14].mxu1  ;;  %3150 = vrot.lane.b32.xlu0 (!%p3931_p6), %v3093_v11, %s4601_s28  ;;  %v3397_v14 = vld [vmem:[%s5244_s6] sm:$0xff] (!%p3931_p6)  ;;  %v3398_v15 = vld [vmem:[%s5244_s6 + $0x8] sm:$0xff] (!%p3931_p6)  ;;  %v3399_v16 = vld [vmem:[%s5244_s6 + $0x10] sm:$0xff] (!%p3931_p6)  ;;  %v4602_v18 = vmov (!%p3931_p6), 0.0|0.0  }
 0x22e   : > { %v3999_v23 = vpop.f32.mrb[15].mxu0  ;;  %v4021_v24 = vpop.f32.mrb[15].mxu1  ;;  %4075 = vmatprep.subr.bf16.mxu0 (!%p3931_p6), %v4602_v18  ;;  %v4604_v21 = vmov (!%p3931_p6), 0.0  }
 0x22f   : > { %v2998_v25 = vadd.f32 %v4019_v20, %v3997_v19  ;;  %3041 = sbr.rel (%p3931_p6) target bundleno = 1116 (0x45c), region = 60  ;;  %3148 = vrot.lane.b32.xlu1 (!%p3931_p6), %v5104_v57, %s4601_s28  ;;  %v4076_v19 = vpack.c.bf16 (!%p3931_p6), %v3398_v15, %v3397_v14  ;;  %v3400_v20 = vld [vmem:[%s5244_s6 + $0x18] sm:$0xff] (!%p3931_p6)  ;;  %4072 = vmatprep.mubr.msk.f32.mxu0 (!%p3931_p6), %vm4603_vm0, %v4604_v21  ;;  %v3401_v23 = vld [vmem:[%s5244_s6 + $0x20] sm:$0xff] (!%p3931_p6)  ;;  %v3402_v24 = vld [vmem:[%s5244_s6 + $0x28] sm:$0xff] (!%p3931_p6) }
 0x230   : > { %v4079_v22 = vpack.c.bf16 (!%p3931_p6), %v3400_v20, %v3399_v16 }
 0x231   : > { %v3031_v27 = vrot.slane %v2998_v25, %v5079_v59  ;;  %4077 = vmatpush3.bf16.msra.mxu0 (!%p3931_p6), %v4076_v19  ;;  %v4082_v25 = vpack.c.bf16 (!%p3931_p6), %v3402_v24, %v3401_v23 }
 0x232   : > { %4078 = vmatprep.subr.bf16.mxu0 (!%p3931_p6), %v4602_v18 }
 0x233   : > { %v3035_v28 = vadd.f32 %v3031_v27, %v1704_v26  ;;  %3236 = vrot.lane.b32.xlu1 (!%p3931_p6), %v5102_v56, %s4601_s28  ;;  %v3403_v26 = vld [vmem:[%s5244_s6 + $0x30] sm:$0xff] (!%p3931_p6)  ;;  %v3404_v27 = vld [vmem:[%s5244_s6 + $0x38] sm:$0xff] (!%p3931_p6) }
 0x235   : > { %3037 = vst [vmem:[#allocation3 + $0x8] sm:$0x3] %v3035_v28  ;;  %4080 = vmatpush3.bf16.msra.mxu0 (!%p3931_p6), %v4079_v22  ;;  %v4085_v28 = vpack.c.bf16 (!%p3931_p6), %v3404_v27, %v3403_v26 }
 0x236   : > { %4081 = vmatprep.subr.bf16.mxu0 %v4602_v18 }
 0x239   : > { %4083 = vmatpush3.bf16.msra.mxu0 %v4082_v25 }
 0x23a   : > { %4084 = vmatprep.subr.bf16.mxu0 %v4602_v18 }
 0x23c   : > { %v3095_v60 = vld [vmem:[#allocation3 + $0x8] sm:$0x3] }
 0x23d   : > { %v3145_v1 = vadd.f32 %v3141_v12, %v3095_v60  ;;  %4086 = vmatpush3.bf16.msra.mxu0 %v4085_v28  ;;  %v4605_v28 = vmov 269488144  }
 0x23e   : > { %4087 = vmatprep.subr.bf16.mxu0 %v4602_v18  ;;  %v3181_v29 = vunpack.c.l.s4 %v4605_v28 }
 0x23f   : > { %3238 = vrot.lane.b32.xlu0 %v3145_v1, %s4601_s28 }
 0x240   : > { %v3182_v32 = vunpack.c.0.s8 %v3181_v29 }
 0x241   : > { %4089 = vmatpush3.bf16.msra.mxu0 %v4088_v31 }
 0x242   : > { %4090 = vmatprep.subr.bf16.mxu0 %v4602_v18  ;;  %v3185_v17 = vsub.s32 %v3182_v32, %v4728_v47 }
 0x245   : > { %4092 = vmatpush3.bf16.msra.mxu0 %v4091_v33 }
 0x246   : > { %4093 = vmatprep.subr.bf16.mxu0 %v4602_v18 }
 0x249   : > { %4095 = vmatpush3.bf16.msra.mxu0 %v4094_v36 }
 0x24a   : > { %4096 = vmatprep.subr.bf16.mxu0 %v4602_v18 }
 0x24d   : > { %4098 = vmatpush3.bf16.msra.mxu0 %v4097_v39 }
 0x281   : > { %v3210_v42 = vpop.permute.xlu0 %3209 }
 0x282   : > { %v3213_v43 = vsel %vm3157_vm1, %v3208_v41, %v3210_v42 }
 0x283   : > { %v3217_v45 = vsel %vm3155_vm2, %v3213_v43, 0.0 }
 0x295   : > { %v3294_v40 = vpop.permute.xlu1 %3293 }
 0x297   : > { %v3296_v50 = vpop.permute.xlu0 %3295 }
 0x298   : > { %v3299_v51 = vsel %vm3157_vm1, %v3294_v40, %v3296_v50 }
 0x299   : > { %v3212_v62 = vpop.permute.xlu1 %3211  ;;  %v3303_v54 = vsel %vm3155_vm2, %v3299_v51, 0.0 }
 0x29a   : > { %v3214_v44 = vsel %vm3157_vm1, %v3210_v42, %v3212_v62 }
 0x29b   : > { %v3218_v46 = vsel %vm3155_vm2, %v3214_v44, 0.0  ;;  %v3394_v13 = vpop.permute.xlu0 %3393 }
 0x29c   : > { %v3219_v49 = vadd.f32 %v3218_v46, %v3217_v45  ;;  %v5193_v0 = vsel %vm3157_vm1, %v5104_v57, %v3394_v13 }
 0x29d   : > { %v3298_v48 = vpop.permute.xlu1 %3297  ;;  %4073 = vmatmul.mubr.f32.vlgmr.msra.gmra.mrb[0].mxu0 %v5193_v0 }
 0x29e   : > { %v3300_v53 = vsel %vm3157_vm1, %v3296_v50, %v3298_v48  ;;  %3220 = vadd.xlane.f32.xlu1 %v3219_v49 }
 0x29f   : > { %v3304_v58 = vsel %vm3155_vm2, %v3300_v53, 0.0  ;;  %v3151_v55 = vpop.permute.xlu0 %3150 }
 0x2a0   : > { %v3305_v61 = vadd.f32 %v3304_v58, %v3303_v54  ;;  %v3154_v4 = vrot.slane %v3151_v55, 6 }
 0x2a1   : > { %v3149_v63 = vpop.permute.xlu1 %3148 }
 0x2a2   : > { %3306 = vadd.xlane.f32.xlu0 %v3305_v61  ;;  %v3153_v52 = vrot.slane %v3149_v63, 6  ;;  %v3152_v2 = vrot.slane %v3149_v63, 4 }
 0x2a4   : > { %v3156_v5 = vsel %vm3155_vm2, %v3153_v52, %v3154_v4 }
 0x2a5   : > { %v3237_v3 = vpop.permute.xlu1 %3236  ;;  %v3158_v10 = vsel %vm3157_vm1, %v3152_v2, %v3156_v5 }
 0x2a6   : > { %v3241_v6 = vrot.slane %v3237_v3, 6  ;;  %v3240_v9 = vrot.slane %v3237_v3, 4  ;;  %v3160_v12 = vmul.f32 %v3158_v10, %v3158_v10 }
 0x2a8   : > { %v3168_v1 = vrot.slane %v3160_v12, %v5079_v59 }
 0x2aa   : > { %v3169_v15 = vcombine.high %v3168_v1, %v3168_v1  ;;  %v3172_v16 = vsel %vm3155_vm2, %v3168_v1, 0.0 }
 0x2ac   : > { %v3173_v19 = vsel %vm3155_vm2, %v3169_v15, 0.0  ;;  %v3932_v15 = vld [vmem:[%s5245_s7] ss:$0 sm:$0xff] }
 0x2ad   : > { %v3174_v21 = vadd.f32 %v3173_v19, %v3172_v16 }
 0x2af   : > { %3175 = vadd.xlane.f32.xlu0 %v3174_v21 }
 0x2b1   : > { %v3239_v8 = vpop.permute.xlu0 %3238 }
 0x2b2   : > { %v3242_v11 = vrot.slane %v3239_v8, 6 }
 0x2b4   : > { %v3243_v60 = vsel %vm3155_vm2, %v3241_v6, %v3242_v11 }
 0x2b5   : > { %v3244_v14 = vsel %vm3157_vm1, %v3240_v9, %v3243_v60 }
 0x2b6   : > { %v3246_v18 = vmul.f32 %v3244_v14, %v3244_v14 }
 0x2b8   : > { %v3254_v20 = vrot.slane %v3246_v18, %v5079_v59 }
 0x2ba   : > { %v3255_v22 = vcombine.high %v3254_v20, %v3254_v20  ;;  %v3258_v23 = vsel %vm3155_vm2, %v3254_v20, 0.0 }
 0x2bc   : > { %v3259_v24 = vsel %vm3155_vm2, %v3255_v22, 0.0 }
 0x2bd   : > { %v3260_v25 = vadd.f32 %v3259_v24, %v3258_v23 }
 0x2bf   : > { %3261 = vadd.xlane.f32.xlu1 %v3260_v25 }
 0x32b   : > { %v3221_v26 = vpop.xlane.xlu1 %3220 }
 0x32c   : > { %v3222_v27 = vmax.f32 %v3221_v26, 1e-24 }
 0x32e   : > { %4582 = vrsqrt.f32 %v3222_v27 }
 0x32f   : > { %v3307_v30 = vpop.xlane.xlu0 %3306 }
 0x330   : > { %v3308_v31 = vmax.f32 %v3307_v30, 1e-24 }
 0x332   : > { %4584 = vrsqrt.f32 %v3308_v31 }
 0x338   : > { %v4583_v33 = vpop.eup %4582 }
 0x339   : > { %v3231_v34 = vrot.slane %v4583_v33, %v3185_v17 }
 0x33b   : > { %v3233_v35 = vmul.f32 %v3231_v34, %v5104_v57 }
 0x33c   : > { %v4585_v36 = vpop.eup %4584  ;;  %v3176_v39 = vpop.xlane.xlu0 %3175 }
 0x33d   : > { %3339 = vrot.lane.b32.xlu0 %v3233_v35, %s4601_s28  ;;  %v3317_v37 = vrot.slane %v4585_v36, %v3185_v17  ;;  %v3177_v40 = vmax.f32 %v3176_v39, 1e-24 }
 0x33f   : > { %v3319_v38 = vmul.f32 %v3317_v37, %v5102_v56  ;;  %4586 = vrsqrt.f32 %v3177_v40 }
 0x341   : > { %3363 = vrot.lane.b32.xlu1 %v3319_v38, %s4601_s28  ;;  %s4606_s28 = smov 96  }
 0x349   : > { %v4587_v42 = vpop.eup %4586 }
 0x34a   : > { %v3186_v47 = vrot.slane %v4587_v42, %v3185_v17 }
 0x34c   : > { %v3262_v41 = vpop.xlane.xlu1 %3261  ;;  %v3188_v45 = vmul.f32 %v3186_v47, %v3158_v10 }
 0x34d   : > { %v3263_v62 = vmax.f32 %v3262_v41, 1e-24 }
 0x34f   : > { %4588 = vrsqrt.f32 %v3263_v62 }
 0x359   : > { %v4589_v43 = vpop.eup %4588 }
 0x35a   : > { %v3272_v44 = vrot.slane %v4589_v43, %v3185_v17 }
 0x35c   : > { %v3274_v46 = vmul.f32 %v3272_v44, %v3244_v14  ;;  %v3508_v14 = vrot.slane %v5104_v57, %v5079_v59 }
 0x35e   : > { %v3320_v48 = vmul.f32 %v3274_v46, %v3188_v45 }
 0x360   : > { %v3328_v49 = vrot.slane %v3320_v48, %v5079_v59 }
 0x362   : > { %v3329_v50 = vcombine.high %v3328_v49, %v3328_v49  ;;  %v3332_v51 = vsel %vm3155_vm2, %v3328_v49, 0.0 }
 0x364   : > { %v3333_v56 = vsel %vm3155_vm2, %v3329_v50, 0.0 }
 0x365   : > { %v3334_v53 = vadd.f32 %v3333_v56, %v3332_v51 }
 0x367   : > { %3335 = vadd.xlane.f32.xlu1 %v3334_v53 }
 0x370   : > { %v3486_v54 = vpop.f32.mrb[0].mxu0 }
 0x371   : > { %v4074_v58 = vpop.f32.mrb[1].mxu0  ;;  %v3487_v18 = vadd.f32 %v3932_v15, %v3486_v54 }
 0x373   : > { %v3491_v23 = vmul.f32 0.01, %v3487_v18  ;;  %vm3490_vm6 = vcmp.ge.f32.partialorder %v3487_v18, 0.0 }
 0x375   : > { %v3492_v29 = vsel %vm3490_vm6, %v3487_v18, %v3491_v23 }
 0x378   : > { %3499 = vrot.lane.b32.xlu1 %v5123_v7, %s4606_s28 }
 0x3af   : > { %v3340_v61 = vpop.permute.xlu0 %3339 }
 0x3b0   : > { %v3341_v63 = vrot.slane %v3340_v61, 2 }
 0x3b2   : > { %v3342_v13 = vsel %vm3157_vm1, %v3340_v61, %v3341_v63 }
 0x3b3   : > { %v3344_v52 = vmul.f32 %v3342_v13, %v3188_v45  ;;  %v3364_v55 = vpop.permute.xlu1 %3363 }
 0x3b4   : > { %v3365_v2 = vrot.slane %v3364_v55, 2 }
 0x3b5   : > { %v3352_v3 = vrot.slane %v3344_v52, %v5079_v59 }
 0x3b6   : > { %v3366_v4 = vsel %vm3157_vm1, %v3364_v55, %v3365_v2 }
 0x3b7   : > { %v3368_v5 = vmul.f32 %v3366_v4, %v3274_v46  ;;  %v3353_v6 = vcombine.high %v3352_v3, %v3352_v3  ;;  %v3356_v9 = vsel %vm3155_vm2, %v3352_v3, 0.0 }
 0x3b9   : > { %v3376_v8 = vrot.slane %v3368_v5, %v5079_v59  ;;  %v3357_v7 = vsel %vm3155_vm2, %v3353_v6, 0.0 }
 0x3ba   : > { %v3358_v10 = vadd.f32 %v3357_v7, %v3356_v9 }
 0x3bb   : > { %v3377_v11 = vcombine.high %v3376_v8, %v3376_v8  ;;  %v3380_v12 = vsel %vm3155_vm2, %v3376_v8, 0.0 }
 0x3bc   : > { %3359 = vadd.xlane.f32.xlu0 %v3358_v10 }
 0x3bd   : > { %v3381_v60 = vsel %vm3155_vm2, %v3377_v11, 0.0 }
 0x3be   : > { %v3382_v1 = vadd.f32 %v3381_v60, %v3380_v12 }
 0x3c0   : > { %3383 = vadd.xlane.f32.xlu0 %v3382_v1 }
 0x3d6   : > { %3509 = vrot.lane.b32.xlu0 %v3508_v14, %s4607_s22 }
 0x3f4   : > { %v3336_v19 = vpop.xlane.xlu1 %3335 }
 0x3f5   : > { %v3337_v21 = vmul.f32 3.3333333, %v3336_v19 }
 0x3f8   : > { %v3500_v57 = vpop.permute.xlu1 %3499 }
 0x449   : > { %v3360_v16 = vpop.xlane.xlu0 %3359 }
 0x44a   : > { %v3361_v20 = vmul.f32 3.3333333, %v3360_v16 }
 0x44c   : > { %v3494_v25 = vsel %vm3493_vm3, %v3337_v21, %v3361_v20 }
 0x44d   : > { %v3384_v22 = vpop.xlane.xlu0 %3383 }
 0x44e   : > { %v3385_v24 = vmul.f32 3.3333333, %v3384_v22 }
 0x450   : > { %v3496_v26 = vsel %vm3495_vm4, %v3494_v25, %v3385_v24 }
 0x451   : > { %v3498_v27 = vsel %vm3497_vm5, %v3496_v26, 0.0  ;;  %v3510_v28 = vpop.permute.xlu0 %3509 }
 0x452   : > { %v3513_v30 = vsel %vm3512_vm7, %v3500_v57, %v3510_v28  ;;  %v3522_v31 = vcombine.low %v3492_v29, %v3498_v27 }
 0x453   : > { %v3514_v32 = vsel %vm3157_vm1, %v3513_v30, %v3510_v28 }
 0x454   : > { %v3516_v17 = vsel %vm3515_vm8, %v3514_v32, %v3500_v57  ;;  %v3536_v34 = vrot.slane %v3522_v31, %v5079_v59 }
 0x455   : > { %v3521_v33 = vcombine.low %v3516_v17, %v5193_v0 }
 0x457   : > { %v3529_v35 = vrot.slane %v3521_v33, %v5079_v59 }
 0x459   : > { %v3537_v36 = vcombine.low %v3529_v35, %v3536_v34 }
 0x45b   : > { %3539 = vst [vmem:[%s5246_s8] sm:$0xff] %v3537_v36 }
 0x45c PF: > { %s18_s27 = sadd.s32 1, %s4596_s27  }
 0x45d   : > { %p15_p7 = scmp.ge.s32.totalorder %s18_s27, 4  }
 0x45f   :  { %17 = sbr.rel (!%p15_p7) target bundleno = 1 (0x1), region = 95 }

</bundles_post_ra>
